<compile_context>
chip_gen: v6e
topology: v6e:2x2x1
jax: 0.10.0
libtpu: 0.0.40
codegen_flags: <defaults>
</compile_context>

<pallas_src>
import jax
import jax.numpy as jnp
from jax.experimental import pallas as pl
from jax.experimental.pallas import tpu as pltpu

# bf16 packs 16 rows per sublane group; keep batch tiles / offsets aligned so
# bf16 output blocks never start at an unaligned sublane offset.
_ROW_ALIGN = 16


def _round_up(n, m):
    return ((n + m - 1) // m) * m


def _device_kind():
    try:
        return jax.devices()[0].device_kind.lower()
    except Exception:
        return ""


def _select_batch_tile(b_pad, kind):
    """VMEM-capped batch tile with minimal padding; even grid (>=2) on v7x."""
    cap = 2048 if "v5" in kind else 4096          # v5e: stay clear of scoped VMEM
    n_tiles = max(1, -(-b_pad // cap))
    if "v7" in kind and b_pad >= 2 * _ROW_ALIGN:
        n_tiles = max(2, n_tiles)                  # feed both TensorCores
        if n_tiles % 2:
            n_tiles += 1                           # keep the parallel grid even
    return _round_up(-(-b_pad // n_tiles), _ROW_ALIGN)


def _compiler_params(kind):
    if "v7" in kind:
        vmem_limit = 48 * 1024 * 1024   # 64 MiB physical per TC; leave headroom
    else:
        vmem_limit = 64 * 1024 * 1024   # v5e / v6e have 128 MiB physical VMEM
    return pltpu.CompilerParams(
        dimension_semantics=("parallel",),
        vmem_limit_bytes=vmem_limit,
    )


def _mlp_kernel(x_ref, w1_ref, b1_ref, w2_ref, b2_ref, w3_ref, b3_ref,
                wo_ref, bo_ref, out_ref):
    """Fused 4-layer MLP for one batch tile.

    bf16 MXU operands with f32 accumulation; bias add + ReLU in f32; bf16
    re-cast between layers.  x arrives as f32 and is cast here (VPU slack).
    """
    dt = w1_ref.dtype  # compute (MXU) dtype, bf16

    h = jnp.dot(x_ref[...].astype(dt), w1_ref[...],
                preferred_element_type=jnp.float32)
    h = jnp.maximum(h + b1_ref[...], 0.0).astype(dt)

    h = jnp.dot(h, w2_ref[...], preferred_element_type=jnp.float32)
    h = jnp.maximum(h + b2_ref[...], 0.0).astype(dt)

    h = jnp.dot(h, w3_ref[...], preferred_element_type=jnp.float32)
    h = jnp.maximum(h + b3_ref[...], 0.0).astype(dt)

    logits = jnp.dot(h, wo_ref[...], preferred_element_type=jnp.float32) + bo_ref[...]
    out_ref[...] = logits.astype(out_ref.dtype)


def prepare_params(params, *, compute_dtype=jnp.bfloat16, lane=128):
    """One-time conversion of f32 params to kernel-ready form (hoisted out of
    the per-call path): weights cast to bf16, wo/bo zero-padded to 128 lanes
    so output stores stay lane-dense.  Biases stay f32."""
    hidden = params["w1"].shape[1]
    num_classes = params["wo"].shape[1]
    nc_p = _round_up(num_classes, lane)
    wo = jnp.zeros((hidden, nc_p), compute_dtype).at[:, :num_classes].set(
        params["wo"].astype(compute_dtype))
    bo = jnp.zeros((1, nc_p), jnp.float32).at[:, :num_classes].set(
        params["bo"].astype(jnp.float32))
    return {
        "w1": params["w1"].astype(compute_dtype),
        "b1": params["b1"].astype(jnp.float32),
        "w2": params["w2"].astype(compute_dtype),
        "b2": params["b2"].astype(jnp.float32),
        "w3": params["w3"].astype(compute_dtype),
        "b3": params["b3"].astype(jnp.float32),
        "wo": wo,
        "bo": bo,
        "num_classes": num_classes,
    }


def basic_classifier_forward(x, prepared, *, batch_tile=None,
                             out_dtype=jnp.bfloat16):
    """x: (B, input_size) f32.  prepared: output of prepare_params().
    Returns (B, num_classes) logits in out_dtype (the PyTorch module defines
    softmax but never applies it in forward)."""
    B, d_in = x.shape
    hidden = prepared["w1"].shape[1]
    nc_p = prepared["wo"].shape[1]
    num_classes = prepared["num_classes"]
    kind = _device_kind()

    # ---- batch tiling: VMEM-capped, minimal padding, even grid on v7x.
    b_pad = _round_up(B, _ROW_ALIGN)
    if batch_tile is None:
        tile = _select_batch_tile(b_pad, kind)
    else:
        tile = min(_round_up(batch_tile, _ROW_ALIGN), b_pad)
    b_full = _round_up(B, tile)
    grid = (b_full // tile,)

    # Only materialize a padded copy when the batch doesn't tile evenly;
    # x stays f32 (no wrapper-side pad/cast HBM pass).
    xp = x if b_full == B else jnp.zeros((b_full, d_in), x.dtype).at[:B].set(x)

    def run(single_buffer_consts):
        def const_spec(shape):
            idx = lambda i: (0,) * len(shape)
            if single_buffer_consts:
                # Grid-invariant weight/bias blocks: single-buffer (VMEM headroom).
                return pl.BlockSpec(shape, idx, pipeline_mode=pl.Buffered(1))
            return pl.BlockSpec(shape, idx)

        return pl.pallas_call(
            _mlp_kernel,
            out_shape=jax.ShapeDtypeStruct((b_full, nc_p), out_dtype),
            grid_spec=pltpu.PrefetchScalarGridSpec(
                num_scalar_prefetch=0,
                grid=grid,
                in_specs=[
                    pl.BlockSpec((tile, d_in), lambda i: (i, 0)),  # x: f32, 32 lanes
                    const_spec((d_in, hidden)),                     # w1
                    const_spec((1, hidden)),                        # b1
                    const_spec((hidden, hidden)),                   # w2
                    const_spec((1, hidden)),                        # b2
                    const_spec((hidden, hidden)),                   # w3
                    const_spec((1, hidden)),                        # b3
                    const_spec((hidden, nc_p)),                     # wo (lane-padded)
                    const_spec((1, nc_p)),                          # bo (lane-padded)
                ],
                out_specs=pl.BlockSpec((tile, nc_p), lambda i: (i, 0)),
            ),
            compiler_params=_compiler_params(kind),
        )(xp, prepared["w1"], prepared["b1"], prepared["w2"], prepared["b2"],
          prepared["w3"], prepared["b3"], prepared["wo"], prepared["bo"])

    try:
        out = run(single_buffer_consts=True)
    except Exception:
        # Fallback for jax builds without BlockSpec(pipeline_mode=...) support.
        out = run(single_buffer_consts=False)

    # TODO(synk): fuse the downstream consumer (argmax / softmax+top-k) into the
    # kernel so only a (B, small) result leaves VMEM instead of slicing here.
    return out[:B, :num_classes]


def init_params(key, input_size, num_classes, hidden=256):
    """Deterministic init mirroring the PyTorch module's shapes.
    fc1-fc3 weights: kaiming normal (fan_in) -> std = sqrt(2 / fan_in).
    output weights / all biases: PyTorch Linear default U(-1/sqrt(fan_in), ...).
    Weights are stored as (in_features, out_features) so y = x @ W + b."""
    ks = jax.random.split(key, 8)

    def kaiming(k, fan_in, fan_out):
        std = jnp.sqrt(2.0 / fan_in)
        return jax.random.normal(k, (fan_in, fan_out), jnp.float32) * std

    def uniform(k, shape, fan_in):
        bound = 1.0 / jnp.sqrt(fan_in)
        return jax.random.uniform(k, shape, jnp.float32, -bound, bound)

    return {
        "w1": kaiming(ks[0], input_size, hidden),
        "b1": uniform(ks[1], (1, hidden), input_size),
        "w2": kaiming(ks[2], hidden, hidden),
        "b2": uniform(ks[3], (1, hidden), hidden),
        "w3": kaiming(ks[4], hidden, hidden),
        "b3": uniform(ks[5], (1, hidden), hidden),
        "wo": uniform(ks[6], (hidden, num_classes), hidden),
        "bo": uniform(ks[7], (1, num_classes), hidden),
    }


def reference_forward(x, p, compute_dtype=jnp.bfloat16):
    """Plain-JAX reference mirroring the kernel's numerics
    (bf16 MXU operands, f32 accumulation + bias/ReLU)."""
    dt = compute_dtype
    h = jnp.dot(x.astype(dt), p["w1"].astype(dt),
                preferred_element_type=jnp.float32) + p["b1"]
    h = jnp.maximum(h, 0.0).astype(dt)
    h = jnp.dot(h, p["w2"].astype(dt),
                preferred_element_type=jnp.float32) + p["b2"]
    h = jnp.maximum(h, 0.0).astype(dt)
    h = jnp.dot(h, p["w3"].astype(dt),
                preferred_element_type=jnp.float32) + p["b3"]
    h = jnp.maximum(h, 0.0).astype(dt)
    return jnp.dot(h, p["wo"].astype(dt),
                   preferred_element_type=jnp.float32) + p["bo"]


if __name__ == "__main__":
    key = jax.random.PRNGKey(0)
    k_params, k_x1, k_x2 = jax.random.split(key, 3)

    input_size, num_classes = 32, 10
    params = init_params(k_params, input_size, num_classes)
    prepared = prepare_params(params)   # hoisted weight cast / lane-pad, once

    # Small batch: single-tile path (padded up to the 16-row alignment).
    x_small = jax.random.normal(k_x1, (8, input_size), jnp.float32)
    out_small = jax.block_until_ready(basic_classifier_forward(x_small, prepared))
    ref_small = reference_forward(x_small, params)
    assert out_small.shape == (8, num_classes)
    assert jnp.allclose(out_small.astype(jnp.float32), ref_small,
                        atol=2e-2, rtol=2e-2), "small-batch mismatch vs reference"

    # Non-multiple batch: exercises batch padding; grid of 2 on v7x (both TCs),
    # single tile on v5e/v6e.
    x_big = jax.random.normal(k_x2, (200, input_size), jnp.float32)
    out_big = jax.block_until_ready(basic_classifier_forward(x_big, prepared))
    ref_big = reference_forward(x_big, params)
    assert out_big.shape == (200, num_classes)
    assert jnp.allclose(out_big.astype(jnp.float32), ref_big,
                        atol=2e-2, rtol=2e-2), "large-batch mismatch vs reference"

    print("KERNEL_OK")
</pallas_src>

<mosaic_0001>
module attributes {stable_mosaic.version = 11 : i64} {
  func.func @_mlp_kernel(%arg0: i32, %arg1: memref<16x32xf32, #tpu.memory_space<vmem>>, %arg2: memref<32x256xbf16, #tpu.memory_space<vmem>>, %arg3: memref<1x256xf32, #tpu.memory_space<vmem>>, %arg4: memref<256x256xbf16, #tpu.memory_space<vmem>>, %arg5: memref<1x256xf32, #tpu.memory_space<vmem>>, %arg6: memref<256x256xbf16, #tpu.memory_space<vmem>>, %arg7: memref<1x256xf32, #tpu.memory_space<vmem>>, %arg8: memref<256x128xbf16, #tpu.memory_space<vmem>>, %arg9: memref<1x128xf32, #tpu.memory_space<vmem>>, %arg10: memref<16x128xbf16, #tpu.memory_space<vmem>>) attributes {dimension_semantics = [#tpu.dimension_semantics<parallel>], iteration_bounds = array<i64: 1>, scalar_prefetch = 0 : i64, scratch_operands = 0 : i64, tpu.core_type = #tpu.core_type<tc>, window_params = [{transform_indices = @transform_0, window_bounds = array<i64: 16, 32>}, {pipeline_mode = #tpu.pipeline_mode<synchronous>, transform_indices = @transform_1, window_bounds = array<i64: 32, 256>}, {pipeline_mode = #tpu.pipeline_mode<synchronous>, transform_indices = @transform_2, window_bounds = array<i64: 1, 256>}, {pipeline_mode = #tpu.pipeline_mode<synchronous>, transform_indices = @transform_3, window_bounds = array<i64: 256, 256>}, {pipeline_mode = #tpu.pipeline_mode<synchronous>, transform_indices = @transform_4, window_bounds = array<i64: 1, 256>}, {pipeline_mode = #tpu.pipeline_mode<synchronous>, transform_indices = @transform_5, window_bounds = array<i64: 256, 256>}, {pipeline_mode = #tpu.pipeline_mode<synchronous>, transform_indices = @transform_6, window_bounds = array<i64: 1, 256>}, {pipeline_mode = #tpu.pipeline_mode<synchronous>, transform_indices = @transform_7, window_bounds = array<i64: 256, 128>}, {pipeline_mode = #tpu.pipeline_mode<synchronous>, transform_indices = @transform_8, window_bounds = array<i64: 1, 128>}, {transform_indices = @transform_9, window_bounds = array<i64: 16, 128>}]} {
    %c0 = arith.constant 0 : index
    %c0_0 = arith.constant 0 : index
    %0 = vector.load %arg1[%c0, %c0_0] : memref<16x32xf32, #tpu.memory_space<vmem>>, vector<16x32xf32>
    %1 = arith.truncf %0 : vector<16x32xf32> to vector<16x32xbf16>
    %c0_1 = arith.constant 0 : index
    %c0_2 = arith.constant 0 : index
    %2 = vector.load %arg2[%c0_1, %c0_2] : memref<32x256xbf16, #tpu.memory_space<vmem>>, vector<32x256xbf16>
    %cst = arith.constant dense<0.000000e+00> : vector<16x256xf32>
    %3 = tpu.matmul %1, %2, %cst {dimension_numbers = #tpu.dot_dimension_numbers<[1], [0], [0], [1], [0, 0, 1, 1], [], []>} : vector<16x32xbf16>, vector<32x256xbf16>, vector<16x256xf32> -> vector<16x256xf32>
    %c0_3 = arith.constant 0 : index
    %c0_4 = arith.constant 0 : index
    %4 = vector.load %arg3[%c0_3, %c0_4] : memref<1x256xf32, #tpu.memory_space<vmem>>, vector<1x256xf32>
    %5 = vector.broadcast %4 : vector<1x256xf32> to vector<16x256xf32>
    %6 = arith.addf %3, %5 : vector<16x256xf32>
    %cst_5 = arith.constant 0.000000e+00 : f32
    %7 = vector.broadcast %cst_5 : f32 to vector<16x256xf32>
    %8 = arith.maximumf %6, %7 : vector<16x256xf32>
    %9 = arith.truncf %8 : vector<16x256xf32> to vector<16x256xbf16>
    %c0_6 = arith.constant 0 : index
    %c0_7 = arith.constant 0 : index
    %10 = vector.load %arg4[%c0_6, %c0_7] : memref<256x256xbf16, #tpu.memory_space<vmem>>, vector<256x256xbf16>
    %cst_8 = arith.constant dense<0.000000e+00> : vector<16x256xf32>
    %11 = tpu.matmul %9, %10, %cst_8 {dimension_numbers = #tpu.dot_dimension_numbers<[1], [0], [0], [1], [0, 0, 1, 1], [], []>} : vector<16x256xbf16>, vector<256x256xbf16>, vector<16x256xf32> -> vector<16x256xf32>
    %c0_9 = arith.constant 0 : index
    %c0_10 = arith.constant 0 : index
    %12 = vector.load %arg5[%c0_9, %c0_10] : memref<1x256xf32, #tpu.memory_space<vmem>>, vector<1x256xf32>
    %13 = vector.broadcast %12 : vector<1x256xf32> to vector<16x256xf32>
    %14 = arith.addf %11, %13 : vector<16x256xf32>
    %cst_11 = arith.constant 0.000000e+00 : f32
    %15 = vector.broadcast %cst_11 : f32 to vector<16x256xf32>
    %16 = arith.maximumf %14, %15 : vector<16x256xf32>
    %17 = arith.truncf %16 : vector<16x256xf32> to vector<16x256xbf16>
    %c0_12 = arith.constant 0 : index
    %c0_13 = arith.constant 0 : index
    %18 = vector.load %arg6[%c0_12, %c0_13] : memref<256x256xbf16, #tpu.memory_space<vmem>>, vector<256x256xbf16>
    %cst_14 = arith.constant dense<0.000000e+00> : vector<16x256xf32>
    %19 = tpu.matmul %17, %18, %cst_14 {dimension_numbers = #tpu.dot_dimension_numbers<[1], [0], [0], [1], [0, 0, 1, 1], [], []>} : vector<16x256xbf16>, vector<256x256xbf16>, vector<16x256xf32> -> vector<16x256xf32>
    %c0_15 = arith.constant 0 : index
    %c0_16 = arith.constant 0 : index
    %20 = vector.load %arg7[%c0_15, %c0_16] : memref<1x256xf32, #tpu.memory_space<vmem>>, vector<1x256xf32>
    %21 = vector.broadcast %20 : vector<1x256xf32> to vector<16x256xf32>
    %22 = arith.addf %19, %21 : vector<16x256xf32>
    %cst_17 = arith.constant 0.000000e+00 : f32
    %23 = vector.broadcast %cst_17 : f32 to vector<16x256xf32>
    %24 = arith.maximumf %22, %23 : vector<16x256xf32>
    %25 = arith.truncf %24 : vector<16x256xf32> to vector<16x256xbf16>
    %c0_18 = arith.constant 0 : index
    %c0_19 = arith.constant 0 : index
    %26 = vector.load %arg8[%c0_18, %c0_19] : memref<256x128xbf16, #tpu.memory_space<vmem>>, vector<256x128xbf16>
    %cst_20 = arith.constant dense<0.000000e+00> : vector<16x128xf32>
    %27 = tpu.matmul %25, %26, %cst_20 {dimension_numbers = #tpu.dot_dimension_numbers<[1], [0], [0], [1], [0, 0, 1, 1], [], []>} : vector<16x256xbf16>, vector<256x128xbf16>, vector<16x128xf32> -> vector<16x128xf32>
    %c0_21 = arith.constant 0 : index
    %c0_22 = arith.constant 0 : index
    %28 = vector.load %arg9[%c0_21, %c0_22] : memref<1x128xf32, #tpu.memory_space<vmem>>, vector<1x128xf32>
    %29 = vector.broadcast %28 : vector<1x128xf32> to vector<16x128xf32>
    %30 = arith.addf %27, %29 : vector<16x128xf32>
    %31 = arith.truncf %30 : vector<16x128xf32> to vector<16x128xbf16>
    %c0_23 = arith.constant 0 : index
    %c0_24 = arith.constant 0 : index
    %32 = vector.load %arg10[%c0_23, %c0_24] : memref<16x128xbf16, #tpu.memory_space<vmem>>, vector<16x128xbf16>
    tpu.vector_store %arg10[%c0_23, %c0_24], %31 {strides = array<i32>} : memref<16x128xbf16, #tpu.memory_space<vmem>>, vector<16x128xbf16>,
    return
  }
  func.func @transform_0(%arg0: i32) -> (i32, i32) {
    %c0_i32 = arith.constant 0 : i32
    %c0_i32_0 = arith.constant 0 : i32
    return %arg0, %c0_i32 : i32, i32
  }
  func.func @transform_1(%arg0: i32) -> (i32, i32) {
    %c0_i32 = arith.constant 0 : i32
    %c0_i32_0 = arith.constant 0 : i32
    %c0_i32_1 = arith.constant 0 : i32
    return %c0_i32, %c0_i32_0 : i32, i32
  }
  func.func @transform_2(%arg0: i32) -> (i32, i32) {
    %c0_i32 = arith.constant 0 : i32
    %c0_i32_0 = arith.constant 0 : i32
    %c0_i32_1 = arith.constant 0 : i32
    return %c0_i32, %c0_i32_0 : i32, i32
  }
  func.func @transform_3(%arg0: i32) -> (i32, i32) {
    %c0_i32 = arith.constant 0 : i32
    %c0_i32_0 = arith.constant 0 : i32
    %c0_i32_1 = arith.constant 0 : i32
    return %c0_i32, %c0_i32_0 : i32, i32
  }
  func.func @transform_4(%arg0: i32) -> (i32, i32) {
    %c0_i32 = arith.constant 0 : i32
    %c0_i32_0 = arith.constant 0 : i32
    %c0_i32_1 = arith.constant 0 : i32
    return %c0_i32, %c0_i32_0 : i32, i32
  }
  func.func @transform_5(%arg0: i32) -> (i32, i32) {
    %c0_i32 = arith.constant 0 : i32
    %c0_i32_0 = arith.constant 0 : i32
    %c0_i32_1 = arith.constant 0 : i32
    return %c0_i32, %c0_i32_0 : i32, i32
  }
  func.func @transform_6(%arg0: i32) -> (i32, i32) {
    %c0_i32 = arith.constant 0 : i32
    %c0_i32_0 = arith.constant 0 : i32
    %c0_i32_1 = arith.constant 0 : i32
    return %c0_i32, %c0_i32_0 : i32, i32
  }
  func.func @transform_7(%arg0: i32) -> (i32, i32) {
    %c0_i32 = arith.constant 0 : i32
    %c0_i32_0 = arith.constant 0 : i32
    %c0_i32_1 = arith.constant 0 : i32
    return %c0_i32, %c0_i32_0 : i32, i32
  }
  func.func @transform_8(%arg0: i32) -> (i32, i32) {
    %c0_i32 = arith.constant 0 : i32
    %c0_i32_0 = arith.constant 0 : i32
    %c0_i32_1 = arith.constant 0 : i32
    return %c0_i32, %c0_i32_0 : i32, i32
  }
  func.func @transform_9(%arg0: i32) -> (i32, i32) {
    %c0_i32 = arith.constant 0 : i32
    %c0_i32_0 = arith.constant 0 : i32
    return %arg0, %c0_i32 : i32, i32
  }
}

module attributes {stable_mosaic.version = 11 : i64} {
  func.func @_mlp_kernel(%arg0: i32, %arg1: memref<16x32xf32, #tpu.memory_space<vmem>>, %arg2: memref<32x256xbf16, #tpu.memory_space<vmem>>, %arg3: memref<1x256xf32, #tpu.memory_space<vmem>>, %arg4: memref<256x256xbf16, #tpu.memory_space<vmem>>, %arg5: memref<1x256xf32, #tpu.memory_space<vmem>>, %arg6: memref<256x256xbf16, #tpu.memory_space<vmem>>, %arg7: memref<1x256xf32, #tpu.memory_space<vmem>>, %arg8: memref<256x128xbf16, #tpu.memory_space<vmem>>, %arg9: memref<1x128xf32, #tpu.memory_space<vmem>>, %arg10: memref<16x128xbf16, #tpu.memory_space<vmem>>) attributes {dimension_semantics = [#tpu.dimension_semantics<parallel>], iteration_bounds = array<i64: 1>, scalar_prefetch = 0 : i64, scratch_operands = 0 : i64, tpu.core_type = #tpu.core_type<tc>, window_params = [{transform_indices = @transform_0, window_bounds = array<i64: 16, 32>}, {pipeline_mode = #tpu.pipeline_mode<synchronous>, transform_indices = @transform_1, window_bounds = array<i64: 32, 256>}, {pipeline_mode = #tpu.pipeline_mode<synchronous>, transform_indices = @transform_2, window_bounds = array<i64: 1, 256>}, {pipeline_mode = #tpu.pipeline_mode<synchronous>, transform_indices = @transform_3, window_bounds = array<i64: 256, 256>}, {pipeline_mode = #tpu.pipeline_mode<synchronous>, transform_indices = @transform_4, window_bounds = array<i64: 1, 256>}, {pipeline_mode = #tpu.pipeline_mode<synchronous>, transform_indices = @transform_5, window_bounds = array<i64: 256, 256>}, {pipeline_mode = #tpu.pipeline_mode<synchronous>, transform_indices = @transform_6, window_bounds = array<i64: 1, 256>}, {pipeline_mode = #tpu.pipeline_mode<synchronous>, transform_indices = @transform_7, window_bounds = array<i64: 256, 128>}, {pipeline_mode = #tpu.pipeline_mode<synchronous>, transform_indices = @transform_8, window_bounds = array<i64: 1, 128>}, {transform_indices = @transform_9, window_bounds = array<i64: 16, 128>}]} {
    %c0 = arith.constant 0 : index
    %c0_0 = arith.constant 0 : index
    %0 = vector.load %arg1[%c0, %c0_0] : memref<16x32xf32, #tpu.memory_space<vmem>>, vector<16x32xf32>
    %1 = arith.truncf %0 : vector<16x32xf32> to vector<16x32xbf16>
    %c0_1 = arith.constant 0 : index
    %c0_2 = arith.constant 0 : index
    %2 = vector.load %arg2[%c0_1, %c0_2] : memref<32x256xbf16, #tpu.memory_space<vmem>>, vector<32x256xbf16>
    %cst = arith.constant dense<0.000000e+00> : vector<16x256xf32>
    %3 = tpu.matmul %1, %2, %cst {dimension_numbers = #tpu.dot_dimension_numbers<[1], [0], [0], [1], [0, 0, 1, 1], [], []>} : vector<16x32xbf16>, vector<32x256xbf16>, vector<16x256xf32> -> vector<16x256xf32>
    %c0_3 = arith.constant 0 : index
    %c0_4 = arith.constant 0 : index
    %4 = vector.load %arg3[%c0_3, %c0_4] : memref<1x256xf32, #tpu.memory_space<vmem>>, vector<1x256xf32>
    %5 = vector.broadcast %4 : vector<1x256xf32> to vector<16x256xf32>
    %6 = arith.addf %3, %5 : vector<16x256xf32>
    %cst_5 = arith.constant 0.000000e+00 : f32
    %7 = vector.broadcast %cst_5 : f32 to vector<16x256xf32>
    %8 = arith.maximumf %6, %7 : vector<16x256xf32>
    %9 = arith.truncf %8 : vector<16x256xf32> to vector<16x256xbf16>
    %c0_6 = arith.constant 0 : index
    %c0_7 = arith.constant 0 : index
    %10 = vector.load %arg4[%c0_6, %c0_7] : memref<256x256xbf16, #tpu.memory_space<vmem>>, vector<256x256xbf16>
    %cst_8 = arith.constant dense<0.000000e+00> : vector<16x256xf32>
    %11 = tpu.matmul %9, %10, %cst_8 {dimension_numbers = #tpu.dot_dimension_numbers<[1], [0], [0], [1], [0, 0, 1, 1], [], []>} : vector<16x256xbf16>, vector<256x256xbf16>, vector<16x256xf32> -> vector<16x256xf32>
    %c0_9 = arith.constant 0 : index
    %c0_10 = arith.constant 0 : index
    %12 = vector.load %arg5[%c0_9, %c0_10] : memref<1x256xf32, #tpu.memory_space<vmem>>, vector<1x256xf32>
    %13 = vector.broadcast %12 : vector<1x256xf32> to vector<16x256xf32>
    %14 = arith.addf %11, %13 : vector<16x256xf32>
    %cst_11 = arith.constant 0.000000e+00 : f32
    %15 = vector.broadcast %cst_11 : f32 to vector<16x256xf32>
    %16 = arith.maximumf %14, %15 : vector<16x256xf32>
    %17 = arith.truncf %16 : vector<16x256xf32> to vector<16x256xbf16>
    %c0_12 = arith.constant 0 : index
    %c0_13 = arith.constant 0 : index
    %18 = vector.load %arg6[%c0_12, %c0_13] : memref<256x256xbf16, #tpu.memory_space<vmem>>, vector<256x256xbf16>
    %cst_14 = arith.constant dense<0.000000e+00> : vector<16x256xf32>
    %19 = tpu.matmul %17, %18, %cst_14 {dimension_numbers = #tpu.dot_dimension_numbers<[1], [0], [0], [1], [0, 0, 1, 1], [], []>} : vector<16x256xbf16>, vector<256x256xbf16>, vector<16x256xf32> -> vector<16x256xf32>
    %c0_15 = arith.constant 0 : index
    %c0_16 = arith.constant 0 : index
    %20 = vector.load %arg7[%c0_15, %c0_16] : memref<1x256xf32, #tpu.memory_space<vmem>>, vector<1x256xf32>
    %21 = vector.broadcast %20 : vector<1x256xf32> to vector<16x256xf32>
    %22 = arith.addf %19, %21 : vector<16x256xf32>
    %cst_17 = arith.constant 0.000000e+00 : f32
    %23 = vector.broadcast %cst_17 : f32 to vector<16x256xf32>
    %24 = arith.maximumf %22, %23 : vector<16x256xf32>
    %25 = arith.truncf %24 : vector<16x256xf32> to vector<16x256xbf16>
    %c0_18 = arith.constant 0 : index
    %c0_19 = arith.constant 0 : index
    %26 = vector.load %arg8[%c0_18, %c0_19] : memref<256x128xbf16, #tpu.memory_space<vmem>>, vector<256x128xbf16>
    %cst_20 = arith.constant dense<0.000000e+00> : vector<16x128xf32>
    %27 = tpu.matmul %25, %26, %cst_20 {dimension_numbers = #tpu.dot_dimension_numbers<[1], [0], [0], [1], [0, 0, 1, 1], [], []>} : vector<16x256xbf16>, vector<256x128xbf16>, vector<16x128xf32> -> vector<16x128xf32>
    %c0_21 = arith.constant 0 : index
    %c0_22 = arith.constant 0 : index
    %28 = vector.load %arg9[%c0_21, %c0_22] : memref<1x128xf32, #tpu.memory_space<vmem>>, vector<1x128xf32>
    %29 = vector.broadcast %28 : vector<1x128xf32> to vector<16x128xf32>
    %30 = arith.addf %27, %29 : vector<16x128xf32>
    %31 = arith.truncf %30 : vector<16x128xf32> to vector<16x128xbf16>
    %c0_23 = arith.constant 0 : index
    %c0_24 = arith.constant 0 : index
    %32 = vector.load %arg10[%c0_23, %c0_24] : memref<16x128xbf16, #tpu.memory_space<vmem>>, vector<16x128xbf16>
    tpu.vector_store %arg10[%c0_23, %c0_24], %31 {strides = array<i32>} : memref<16x128xbf16, #tpu.memory_space<vmem>>, vector<16x128xbf16>,
    return
  }
  func.func @transform_0(%arg0: i32) -> (i32, i32) {
    %c0_i32 = arith.constant 0 : i32
    %c0_i32_0 = arith.constant 0 : i32
    return %arg0, %c0_i32 : i32, i32
  }
  func.func @transform_1(%arg0: i32) -> (i32, i32) {
    %c0_i32 = arith.constant 0 : i32
    %c0_i32_0 = arith.constant 0 : i32
    %c0_i32_1 = arith.constant 0 : i32
    return %c0_i32, %c0_i32_0 : i32, i32
  }
  func.func @transform_2(%arg0: i32) -> (i32, i32) {
    %c0_i32 = arith.constant 0 : i32
    %c0_i32_0 = arith.constant 0 : i32
    %c0_i32_1 = arith.constant 0 : i32
    return %c0_i32, %c0_i32_0 : i32, i32
  }
  func.func @transform_3(%arg0: i32) -> (i32, i32) {
    %c0_i32 = arith.constant 0 : i32
    %c0_i32_0 = arith.constant 0 : i32
    %c0_i32_1 = arith.constant 0 : i32
    return %c0_i32, %c0_i32_0 : i32, i32
  }
  func.func @transform_4(%arg0: i32) -> (i32, i32) {
    %c0_i32 = arith.constant 0 : i32
    %c0_i32_0 = arith.constant 0 : i32
    %c0_i32_1 = arith.constant 0 : i32
    return %c0_i32, %c0_i32_0 : i32, i32
  }
  func.func @transform_5(%arg0: i32) -> (i32, i32) {
    %c0_i32 = arith.constant 0 : i32
    %c0_i32_0 = arith.constant 0 : i32
    %c0_i32_1 = arith.constant 0 : i32
    return %c0_i32, %c0_i32_0 : i32, i32
  }
  func.func @transform_6(%arg0: i32) -> (i32, i32) {
    %c0_i32 = arith.constant 0 : i32
    %c0_i32_0 = arith.constant 0 : i32
    %c0_i32_1 = arith.constant 0 : i32
    return %c0_i32, %c0_i32_0 : i32, i32
  }
  func.func @transform_7(%arg0: i32) -> (i32, i32) {
    %c0_i32 = arith.constant 0 : i32
    %c0_i32_0 = arith.constant 0 : i32
    %c0_i32_1 = arith.constant 0 : i32
    return %c0_i32, %c0_i32_0 : i32, i32
  }
  func.func @transform_8(%arg0: i32) -> (i32, i32) {
    %c0_i32 = arith.constant 0 : i32
    %c0_i32_0 = arith.constant 0 : i32
    %c0_i32_1 = arith.constant 0 : i32
    return %c0_i32, %c0_i32_0 : i32, i32
  }
  func.func @transform_9(%arg0: i32) -> (i32, i32) {
    %c0_i32 = arith.constant 0 : i32
    %c0_i32_0 = arith.constant 0 : i32
    return %arg0, %c0_i32 : i32, i32
  }
}

</mosaic_0001>

<bundles_post_ra>
// kernel: tpu_custom_call.1
= control target key start
LH: loop header
LB: loop body
LE: loop exit
PB: predicated region body
PF: predicated region fallthrough
CT: control target
= control target key end

     0   :  { %14 = vsyncpa [#allocation3], 0  ;;  %s1398_s0 = inlined_call_operand.hbm [shape: f32[16,32], index: 0, kind: input, shape index: {}]   ;;  %s1399_s1 = inlined_call_operand.hbm [shape: bf16[32,256], index: 1, kind: input, shape index: {}]   ;;  %s1400_s2 = inlined_call_operand.vmem [shape: f32[1,256], index: 2, kind: input, shape index: {}]   ;;  %s1401_s3 = inlined_call_operand.hbm [shape: bf16[256,256], index: 3, kind: input, shape index: {}]   ;;  %s1402_s4 = inlined_call_operand.vmem [shape: f32[1,256], index: 4, kind: input, shape index: {}]   ;;  %s1403_s5 = inlined_call_operand.hbm [shape: bf16[256,256], index: 5, kind: input, shape index: {}]   ;;  %s1404_s6 = inlined_call_operand.vmem [shape: f32[1,256], index: 6, kind: input, shape index: {}]   ;;  %s1405_s7 = inlined_call_operand.hbm [shape: bf16[256,128], index: 7, kind: input, shape index: {}]   ;;  %s1406_s8 = inlined_call_operand.vmem [shape: f32[1,128], index: 8, kind: input, shape index: {}]   ;;  %s1407_s9 = inlined_call_operand.hbm [shape: bf16[16,128], index: 9, kind: output, shape index: {}]  }
   0x1   :  { %15 = vsyncpa [#allocation6], 0 }
   0x2   :  { %16 = vsyncpa [#allocation9], 0 }
   0x3   :  { %17 = vsyncpa [#allocation4], 0  ;;  %s1279_s30 = smov [#allocation5]   ;;  %s1280_s11 = smov [#allocation8]  }
   0x4   :  { %s35_s10 = sshll.u32 %s1279_s30, 4  ;;  %s63_s12 = sshll.u32 %s1280_s11, 4  ;;  %s36_s10 = int_to_ptr.vmem [resolvable:$true] %s35_s10  ;;  %s64_s12 = int_to_ptr.vmem [resolvable:$true] %s63_s12 }
   0x5   :  { %s1159_s13 = scalar_lea.vmem %s36_s10, 512  ;;  %p1164_p1 = scmp.lt.s32.totalorder %s36_s10, %s36_s10 }
   0x6   :  { %p1160_p0 = scmp.ne.s32.totalorder %s36_s10, %s1159_s13  ;;  %p1165_p2 = scmp.lt.s32.totalorder %s1159_s13, %s1159_s13 }
   0x8   :  { %p1166_p3 = por %p1165_p2, %p1164_p1 }
   0xa   :  { %p1167_p4 = pnand %p1166_p3, %p1160_p0 }
   0xc   :  { %1170 = shalt.err (!%p1167_p4)
}
   0xd   :  { %s1281_s14 = smov 128   ;;  %s1282_s15 = smov 8  }
   0xe   :  { %41 = dma.hbm_to_vmem [thread:$0]  %s1399_s1, 512, %s36_s10, [#allocation6], %s1281_s14, %s1281_s14, %s1282_s15  }
   0xf   :  { %s1179_s18 = scalar_lea.vmem %s64_s12, 4096  ;;  %p1184_p6 = scmp.lt.s32.totalorder %s64_s12, %s64_s12 }
  0x10   :  { %p1180_p5 = scmp.ne.s32.totalorder %s64_s12, %s1179_s18  ;;  %p1185_p7 = scmp.lt.s32.totalorder %s1179_s18, %s1179_s18 }
  0x12   :  { %p1186_p8 = por %p1185_p7, %p1184_p6 }
  0x14   :  { %p1187_p9 = pnand %p1186_p8, %p1180_p5 }
  0x16   :  { %1190 = shalt.err (!%p1187_p9)
}
  0x17   :  { %69 = dma.hbm_to_vmem [thread:$0]  %s1403_s5, 4096, %s64_s12, [#allocation9], %s1281_s14, %s1281_s14, %s1282_s15  }
  0x18   :  { %s1283_s21 = smov [#allocation2]   ;;  %s1284_s23 = smov [#allocation7]  }
  0x19   :  { %s23_s22 = sshll.u32 %s1283_s21, 4  ;;  %s49_s24 = sshll.u32 %s1284_s23, 4  ;;  %s24_s22 = int_to_ptr.vmem [resolvable:$true] %s23_s22  ;;  %s50_s24 = int_to_ptr.vmem [resolvable:$true] %s49_s24 }
  0x1a   :  { %s1199_s1 = scalar_lea.vmem %s24_s22, 256  ;;  %p1204_p11 = scmp.lt.s32.totalorder %s24_s22, %s24_s22 }
  0x1b   :  { %p1200_p10 = scmp.ne.s32.totalorder %s24_s22, %s1199_s1  ;;  %p1205_p12 = scmp.lt.s32.totalorder %s1199_s1, %s1199_s1 }
  0x1d   :  { %p1206_p13 = por %p1205_p12, %p1204_p11 }
  0x1f   :  { %p1207_p0 = pnand %p1206_p13, %p1200_p10 }
  0x21   :  { %1210 = shalt.err (!%p1207_p0)
}
  0x22   :  { %29 = dma.hbm_to_vmem [thread:$0]  %s1398_s0, 256, %s24_s22, [#allocation3], %s1281_s14, %s1281_s14, %s1282_s15  }
  0x23   :  { %s1219_s5 = scalar_lea.vmem %s50_s24, 4096  ;;  %p1224_p2 = scmp.lt.s32.totalorder %s50_s24, %s50_s24 }
  0x24   :  { %p1220_p1 = scmp.ne.s32.totalorder %s50_s24, %s1219_s5  ;;  %p1225_p3 = scmp.lt.s32.totalorder %s1219_s5, %s1219_s5 }
  0x26   :  { %p1226_p4 = por %p1225_p3, %p1224_p2 }
  0x28   :  { %p1227_p5 = pnand %p1226_p4, %p1220_p1 }
  0x2a   :  { %1230 = shalt.err (!%p1227_p5)
}
  0x2b   :  { %55 = dma.hbm_to_vmem [thread:$0]  %s1401_s3, 4096, %s50_s24, [#allocation6], %s1281_s14, %s1281_s14, %s1282_s15  }
  0x2c   :  { %s1285_s29 = smov [#allocation10]  }
  0x2d   :  { %s77_s30 = sshll.u32 %s1285_s29, 4  ;;  %s78_s30 = int_to_ptr.vmem [resolvable:$true] %s77_s30 }
  0x2e   :  { %s1239_s10 = scalar_lea.vmem %s78_s30, 2048  ;;  %p1244_p7 = scmp.lt.s32.totalorder %s78_s30, %s78_s30 }
  0x2f   :  { %p1240_p6 = scmp.ne.s32.totalorder %s78_s30, %s1239_s10  ;;  %p1245_p8 = scmp.lt.s32.totalorder %s1239_s10, %s1239_s10 }
  0x31   :  { %p1246_p9 = por %p1245_p8, %p1244_p7 }
  0x33   :  { %p1247_p10 = pnand %p1246_p9, %p1240_p6 }
  0x35   :  { %1250 = shalt.err (!%p1247_p10)
}
  0x36   :  { %s1286_s0 = smov 64   ;;  %s1287_s11 = smov 4  }
  0x37   :  { %83 = dma.hbm_to_vmem [thread:$0]  %s1405_s7, 2048, %s78_s30, [#allocation9], %s1286_s0, %s1286_s0, %s1287_s11  }
  0x38   :  { %1271 = dma.done.wait [#allocation3], 256  }
  0x39   :  { %1272 = vsyncadd [#allocation3], 4294967040 }
  0x3a   :  { %1273 = dma.done.wait [#allocation6], 4608  }
  0x3b   :  { %1274 = vsyncadd [#allocation6], 4294962688 }
  0x3c   :  { %1275 = dma.done.wait [#allocation9], 6144  }
  0x3d   :  { %1276 = vsyncadd [#allocation9], 4294961152  ;;  %v1288_v0 = vmov 0   ;;  %v1033_v1 = vld [vmem:[#allocation5 + $0x14] ss:$8 sps:$4 sm:$0xff]   ;;  %vm141_vm0 = vcmask 261120  }
  0x3e   :  { %177 = vmatprep.mubr.bf16.mxu0 %v1288_v0  ;;  %v1035_v2 = vld [vmem:[#allocation5 + $0x10] ss:$8 sps:$4 sm:$0xff]   ;;  %157 = vmatprep.subr.bf16.mxu0 %v1033_v1  ;;  %v1036_v3 = vld [vmem:[#allocation5 + $0x4] ss:$8 sps:$4 sm:$0xff]   ;;  %v1038_v4 = vld [vmem:[#allocation5] ss:$8 sps:$4 sm:$0xff]  }
  0x3f   :  { %v102_v5 = vld [vmem:[#allocation2] sm:$0xff]  ;;  %158 = vmatpush1.bf16.msra.mxu0 %v1035_v2  ;;  %v103_v6 = vld [vmem:[#allocation2 + $0x8] sm:$0xff]  ;;  %v1042_v9 = vld [vmem:[#allocation7 + $0x64] ss:$8 sps:$4 sm:$0xff]   ;;  %v111_v2 = vlaneseq  ;;  %s1289_s17 = smov [#allocation11]  }
  0x40   :  { %159 = vmatprep.subr.bf16.mxu0 %v1036_v3  ;;  %v1039_v7 = vld [vmem:[#allocation7 + $0x74] ss:$8 sps:$4 sm:$0xff]   ;;  %v1041_v8 = vld [vmem:[#allocation7 + $0x70] ss:$8 sps:$4 sm:$0xff]   ;;  %v104_v10 = vpack.c.bf16 %v103_v6, %v102_v5  ;;  %v1044_v11 = vld [vmem:[#allocation7 + $0x60] ss:$8 sps:$4 sm:$0xff]  }
  0x41   :  { %398 = vmatprep.subr.bf16.mxu1 %v1039_v7  ;;  %v1045_v12 = vld [vmem:[#allocation7 + $0x54] ss:$8 sps:$4 sm:$0xff]   ;;  %v1047_v13 = vld [vmem:[#allocation7 + $0x50] ss:$8 sps:$4 sm:$0xff]   ;;  %v1048_v14 = vld [vmem:[#allocation7 + $0x44] ss:$8 sps:$4 sm:$0xff]  }
  0x42   :  { %399 = vmatpush1.bf16.msra.mxu1 %v1041_v8  ;;  %v1050_v15 = vld [vmem:[#allocation7 + $0x40] ss:$8 sps:$4 sm:$0xff]   ;;  %v1051_v16 = vld [vmem:[#allocation7 + $0x34] ss:$8 sps:$4 sm:$0xff]   ;;  %v1053_v17 = vld [vmem:[#allocation7 + $0x30] ss:$8 sps:$4 sm:$0xff]  }
  0x43   :  { %160 = vmatpush1.bf16.msra.mxu0 %v1038_v4  ;;  %400 = vmatprep.subr.bf16.mxu1 %v1042_v9  ;;  %v1054_v18 = vld [vmem:[#allocation7 + $0x24] ss:$8 sps:$4 sm:$0xff]   ;;  %v1056_v19 = vld [vmem:[#allocation7 + $0x20] ss:$8 sps:$4 sm:$0xff]   ;;  %v1057_v20 = vld [vmem:[#allocation7 + $0x14] ss:$8 sps:$4 sm:$0xff]  }
  0x44   :  { %v1059_v21 = vld [vmem:[#allocation7 + $0x10] ss:$8 sps:$4 sm:$0xff]   ;;  %v1060_v22 = vld [vmem:[#allocation7 + $0x4] ss:$8 sps:$4 sm:$0xff]   ;;  %v1062_v23 = vld [vmem:[#allocation7] ss:$8 sps:$4 sm:$0xff]  }
  0x45   :  { %v1063_v24 = vld [vmem:[#allocation7 + $0xf4] ss:$8 sps:$4 sm:$0xff]   ;;  %v1065_v25 = vld [vmem:[#allocation7 + $0xf0] ss:$8 sps:$4 sm:$0xff]   ;;  %v1066_v26 = vld [vmem:[#allocation7 + $0xe4] ss:$8 sps:$4 sm:$0xff]  }
  0x46   :  { %909 = vmatmul.mubr.msk.bf16.vlgmr.msra.gmra.mxu0 %vm141_vm0, %v104_v10  ;;  %401 = vmatpush1.bf16.msra.mxu1 %v1044_v11  ;;  %v1068_v27 = vld [vmem:[#allocation7 + $0xe0] ss:$8 sps:$4 sm:$0xff]   ;;  %v1069_v28 = vld [vmem:[#allocation7 + $0xd4] ss:$8 sps:$4 sm:$0xff]   ;;  %v1071_v29 = vld [vmem:[#allocation7 + $0xd0] ss:$8 sps:$4 sm:$0xff]  }
  0x47   :  { %402 = vmatprep.subr.bf16.mxu1 %v1045_v12  ;;  %v1072_v30 = vld [vmem:[#allocation7 + $0xc4] ss:$8 sps:$4 sm:$0xff]   ;;  %v1074_v31 = vld [vmem:[#allocation7 + $0xc0] ss:$8 sps:$4 sm:$0xff]   ;;  %v1075_v32 = vld [vmem:[#allocation7 + $0xb4] ss:$8 sps:$4 sm:$0xff]  }
  0x48   :  { %v1077_v33 = vld [vmem:[#allocation7 + $0xb0] ss:$8 sps:$4 sm:$0xff]   ;;  %v1078_v34 = vld [vmem:[#allocation7 + $0xa4] ss:$8 sps:$4 sm:$0xff]   ;;  %v1080_v35 = vld [vmem:[#allocation7 + $0xa0] ss:$8 sps:$4 sm:$0xff]  }
  0x49   :  { %v1081_v36 = vld [vmem:[#allocation7 + $0x94] ss:$8 sps:$4 sm:$0xff]   ;;  %v1083_v37 = vld [vmem:[#allocation7 + $0x90] ss:$8 sps:$4 sm:$0xff]   ;;  %v1084_v38 = vld [vmem:[#allocation7 + $0x84] ss:$8 sps:$4 sm:$0xff]  }
  0x4a   :  { %403 = vmatpush1.bf16.msra.mxu1 %v1047_v13  ;;  %v1086_v39 = vld [vmem:[#allocation7 + $0x80] ss:$8 sps:$4 sm:$0xff]   ;;  %v1087_v40 = vld [vmem:[#allocation8 + $0x70] ss:$8 sps:$4 sm:$0xff]   ;;  %v1089_v41 = vld [vmem:[#allocation8 + $0x74] ss:$8 sps:$4 sm:$0xff]  }
  0x4b   :  { %404 = vmatprep.subr.bf16.mxu1 %v1048_v14  ;;  %v1092_v42 = vld [vmem:[#allocation8 + $0x64] ss:$8 sps:$4 sm:$0xff]   ;;  %651 = vmatprep.subr.bf16.mxu0 %v1089_v41  ;;  %v1090_v43 = vld [vmem:[#allocation8 + $0x60] ss:$8 sps:$4 sm:$0xff]   ;;  %v1095_v44 = vld [vmem:[#allocation8 + $0x54] ss:$8 sps:$4 sm:$0xff]  }
  0x4c   :  { %652 = vmatpush1.bf16.msra.mxu0 %v1087_v40  ;;  %v1093_v45 = vld [vmem:[#allocation8 + $0x50] ss:$8 sps:$4 sm:$0xff]   ;;  %v1098_v46 = vld [vmem:[#allocation8 + $0x44] ss:$8 sps:$4 sm:$0xff]   ;;  %v1096_v47 = vld [vmem:[#allocation8 + $0x40] ss:$8 sps:$4 sm:$0xff]  }
  0x4d   :  { %653 = vmatprep.subr.bf16.mxu0 %v1092_v42  ;;  %v1101_v48 = vld [vmem:[#allocation8 + $0x34] ss:$8 sps:$4 sm:$0xff]   ;;  %v1099_v49 = vld [vmem:[#allocation8 + $0x30] ss:$8 sps:$4 sm:$0xff]   ;;  %v1104_v50 = vld [vmem:[#allocation8 + $0x24] ss:$8 sps:$4 sm:$0xff]  }
  0x4e   :  { %405 = vmatpush1.bf16.msra.mxu1 %v1050_v15  ;;  %v1102_v51 = vld [vmem:[#allocation8 + $0x20] ss:$8 sps:$4 sm:$0xff]   ;;  %v1107_v52 = vld [vmem:[#allocation8 + $0x14] ss:$8 sps:$4 sm:$0xff]   ;;  %v1105_v53 = vld [vmem:[#allocation8 + $0x10] ss:$8 sps:$4 sm:$0xff]  }
  0x4f   :  { %406 = vmatprep.subr.bf16.mxu1 %v1051_v16  ;;  %v1110_v54 = vld [vmem:[#allocation8 + $0x4] ss:$8 sps:$4 sm:$0xff]   ;;  %v1108_v55 = vld [vmem:[#allocation8] ss:$8 sps:$4 sm:$0xff]   ;;  %v1113_v56 = vld [vmem:[#allocation8 + $0xf4] ss:$8 sps:$4 sm:$0xff]  }
  0x50   :  { %654 = vmatpush1.bf16.msra.mxu0 %v1090_v43  ;;  %v1111_v57 = vld [vmem:[#allocation8 + $0xf0] ss:$8 sps:$4 sm:$0xff]   ;;  %v1116_v58 = vld [vmem:[#allocation8 + $0xe4] ss:$8 sps:$4 sm:$0xff]   ;;  %v1114_v59 = vld [vmem:[#allocation8 + $0xe0] ss:$8 sps:$4 sm:$0xff]  }
  0x51   :  { %655 = vmatprep.subr.bf16.mxu0 %v1095_v44  ;;  %v1119_v60 = vld [vmem:[#allocation8 + $0xd4] ss:$8 sps:$4 sm:$0xff]   ;;  %v1117_v61 = vld [vmem:[#allocation8 + $0xd0] ss:$8 sps:$4 sm:$0xff]   ;;  %v1122_v62 = vld [vmem:[#allocation8 + $0xc4] ss:$8 sps:$4 sm:$0xff]  }
  0x52   :  { %407 = vmatpush1.bf16.msra.mxu1 %v1053_v17  ;;  %v1120_v63 = vld [vmem:[#allocation8 + $0xc0] ss:$8 sps:$4 sm:$0xff]   ;;  %v1125_v0 = vld [vmem:[#allocation8 + $0xb4] ss:$8 sps:$4 sm:$0xff]   ;;  %v1123_v1 = vld [vmem:[#allocation8 + $0xb0] ss:$8 sps:$4 sm:$0xff]  }
  0x53   :  { %408 = vmatprep.subr.bf16.mxu1 %v1054_v18  ;;  %v112_v3 = vshrl.u32 %v111_v2, 7  ;;  %v109_v6 = vld [vmem:[%s1400_s2] sm:$0x3]  ;;  %s891_s18 = sshll.u32 %s1289_s17, 4  ;;  %s892_s18 = int_to_ptr.vmem [resolvable:$true] %s891_s18 }
  0x54   :  { %656 = vmatpush1.bf16.msra.mxu0 %v1093_v45  ;;  %s1251_s19 = scalar_lea.vmem %s892_s18, 128  ;;  %p1256_p12 = scmp.lt.s32.totalorder %s892_s18, %s892_s18 }
  0x55   :  { %657 = vmatprep.subr.bf16.mxu0 %v1098_v46  ;;  %v1370_v4 = vsub.s32 1, %v112_v3  ;;  %v1372_v5 = vsub.s32 0, %v112_v3  ;;  %p1252_p11 = scmp.ne.s32.totalorder %s892_s18, %s1251_s19  ;;  %p1257_p13 = scmp.lt.s32.totalorder %s1251_s19, %s1251_s19 }
  0x56   :  { %409 = vmatpush1.bf16.msra.mxu1 %v1056_v19 }
  0x57   :  { %410 = vmatprep.subr.bf16.mxu1 %v1057_v20  ;;  %v118_v8 = vrot.slane %v109_v6, %v1370_v4  ;;  %v114_v9 = vrot.slane %v109_v6, %v1372_v5  ;;  %p1258_p0 = por %p1257_p13, %p1256_p12 }
  0x58   :  { %658 = vmatpush1.bf16.msra.mxu0 %v1096_v47 }
  0x59   :  { %659 = vmatprep.subr.bf16.mxu0 %v1101_v48  ;;  %p1259_p1 = pnand %p1258_p0, %p1252_p11 }
  0x5a   :  { %411 = vmatpush1.bf16.msra.mxu1 %v1059_v21 }
  0x5b   :  { %412 = vmatprep.subr.bf16.mxu1 %v1060_v22 }
  0x5c   :  { %660 = vmatpush1.bf16.msra.mxu0 %v1099_v49 }
  0x5d   :  { %661 = vmatprep.subr.bf16.mxu0 %v1104_v50 }
  0x5e   :  { %413 = vmatpush1.bf16.msra.mxu1 %v1062_v23  ;;  %v1128_v23 = vld [vmem:[#allocation8 + $0xa4] ss:$8 sps:$4 sm:$0xff]  }
  0x5f   :  { %414 = vmatprep.subr.bf16.mxu1 %v1063_v24  ;;  %v1126_v24 = vld [vmem:[#allocation8 + $0xa0] ss:$8 sps:$4 sm:$0xff]  }
  0x60   :  { %662 = vmatpush1.bf16.msra.mxu0 %v1102_v51 }
  0x61   :  { %663 = vmatprep.subr.bf16.mxu0 %v1107_v52 }
  0x62   :  { %415 = vmatpush2.bf16.msra.mxu1 %v1065_v25  ;;  %v1131_v25 = vld [vmem:[#allocation8 + $0x94] ss:$8 sps:$4 sm:$0xff]  }
  0x63   :  { %416 = vmatprep.subr.bf16.mxu1 %v1066_v26  ;;  %v1129_v26 = vld [vmem:[#allocation8 + $0x90] ss:$8 sps:$4 sm:$0xff]  }
  0x64   :  { %664 = vmatpush1.bf16.msra.mxu0 %v1105_v53 }
  0x65   :  { %665 = vmatprep.subr.bf16.mxu0 %v1110_v54 }
  0x66   :  { %417 = vmatpush2.bf16.msra.mxu1 %v1068_v27  ;;  %v1134_v27 = vld [vmem:[#allocation8 + $0x84] ss:$8 sps:$4 sm:$0xff]  }
  0x67   :  { %418 = vmatprep.subr.bf16.mxu1 %v1069_v28  ;;  %v1132_v28 = vld [vmem:[#allocation8 + $0x80] ss:$8 sps:$4 sm:$0xff]  }
  0x68   :  { %666 = vmatpush1.bf16.msra.mxu0 %v1108_v55 }
  0x69   :  { %667 = vmatprep.subr.bf16.mxu0 %v1113_v56  ;;  %v1145_v56 = vld [vmem:[#allocation10 + $0x50] sm:$0xff]  }
  0x6a   :  { %419 = vmatpush2.bf16.msra.mxu1 %v1071_v29  ;;  %v1135_v29 = vld [vmem:[#allocation10 + $0x78] sm:$0xff]  }
  0x6b   :  { %420 = vmatprep.subr.bf16.mxu1 %v1072_v30  ;;  %v1136_v30 = vld [vmem:[#allocation10 + $0x38] sm:$0xff]  }
  0x6c   :  { %668 = vmatpush2.bf16.msra.mxu0 %v1111_v57  ;;  %v1146_v57 = vld [vmem:[#allocation10 + $0x10] sm:$0xff]  }
  0x6d   :  { %669 = vmatprep.subr.bf16.mxu0 %v1116_v58  ;;  %v1147_v58 = vld [vmem:[#allocation10 + $0x48] sm:$0xff]  }
  0x6e   :  { %421 = vmatpush2.bf16.msra.mxu1 %v1074_v31  ;;  %v1137_v31 = vld [vmem:[#allocation10 + $0x70] sm:$0xff]  }
  0x6f   :  { %422 = vmatprep.subr.bf16.mxu1 %v1075_v32  ;;  %v1138_v32 = vld [vmem:[#allocation10 + $0x30] sm:$0xff]  }
  0x70   :  { %670 = vmatpush2.bf16.msra.mxu0 %v1114_v59  ;;  %v1148_v59 = vld [vmem:[#allocation10 + $0x8] sm:$0xff]  }
  0x71   :  { %671 = vmatprep.subr.bf16.mxu0 %v1119_v60  ;;  %v1149_v60 = vld [vmem:[#allocation10 + $0x40] sm:$0xff]  }
  0x72   :  { %423 = vmatpush2.bf16.msra.mxu1 %v1077_v33  ;;  %v1139_v33 = vld [vmem:[#allocation10 + $0x68] sm:$0xff]  }
  0x73   :  { %424 = vmatprep.subr.bf16.mxu1 %v1078_v34  ;;  %v1140_v34 = vld [vmem:[#allocation10 + $0x28] sm:$0xff]  }
  0x74   :  { %672 = vmatpush2.bf16.msra.mxu0 %v1117_v61  ;;  %v1150_v61 = vld [vmem:[#allocation10] sm:$0xff]  }
  0x75   :  { %673 = vmatprep.subr.bf16.mxu0 %v1122_v62  ;;  %v479_v62 = vld [vmem:[%s1404_s6] sm:$0x3] }
  0x76   :  { %425 = vmatpush2.bf16.msra.mxu1 %v1080_v35  ;;  %v1141_v35 = vld [vmem:[#allocation10 + $0x60] sm:$0xff]  }
  0x77   :  { %426 = vmatprep.subr.bf16.mxu1 %v1081_v36  ;;  %v1142_v36 = vld [vmem:[#allocation10 + $0x20] sm:$0xff]  }
  0x78   :  { %674 = vmatpush2.bf16.msra.mxu0 %v1120_v63 }
  0x79   :  { %675 = vmatprep.subr.bf16.mxu0 %v1125_v0  ;;  %v488_v0 = vrot.slane %v479_v62, %v1370_v4 }
  0x7a   :  { %427 = vmatpush2.bf16.msra.mxu1 %v1083_v37  ;;  %v1143_v37 = vld [vmem:[#allocation10 + $0x58] sm:$0xff]  }
  0x7b   :  { %428 = vmatprep.subr.bf16.mxu1 %v1084_v38  ;;  %v1144_v38 = vld [vmem:[#allocation10 + $0x18] sm:$0xff]  }
  0x7c   :  { %676 = vmatpush2.bf16.msra.mxu0 %v1123_v1  ;;  %v484_v1 = vrot.slane %v479_v62, %v1372_v5 }
  0x7d   :  { %677 = vmatprep.subr.bf16.mxu0 %v1128_v23 }
  0x7e   :  { %429 = vmatpush2.bf16.msra.mxu1 %v1086_v39  ;;  %v226_v39 = vld [vmem:[%s1402_s4] sm:$0x3] }
  0x7f   :  { %1000 = vmatprep.subr.bf16.mxu1 %v1135_v29  ;;  %v235_v41 = vrot.slane %v226_v39, %v1370_v4  ;;  %v231_v42 = vrot.slane %v226_v39, %v1372_v5  ;;  %v974_v5 = vld [vmem:[%s1406_s8] ss:$0 sm:$0xff] }
  0x80   :  { %678 = vmatpush2.bf16.msra.mxu0 %v1126_v24 }
  0x81   :  { %679 = vmatprep.subr.bf16.mxu0 %v1131_v25 }
  0x84   :  { %680 = vmatpush2.bf16.msra.mxu0 %v1129_v26 }
  0x85   :  { %681 = vmatprep.subr.bf16.mxu0 %v1134_v27 }
  0x88   :  { %682 = vmatpush2.bf16.msra.mxu0 %v1132_v28 }
 0x106   :  { %v179_v7 = vpop.f32.mrf.mxu0 }
 0x107   :  { %v180_v14 = vadd.f32 %v179_v7, %v114_v9 }
 0x108   :  { %v181_v10 = vpop.f32.mrf.mxu0 }
 0x109   :  { %v182_v12 = vadd.f32 %v181_v10, %v118_v8  ;;  %v188_v20 = vmax.f32 %v180_v14, 0.0 }
 0x10a   :  { %v183_v11 = vpop.f32.mrf.mxu0 }
 0x10b   :  { %v184_v13 = vadd.f32 %v183_v11, %v114_v9  ;;  %v189_v18 = vmax.f32 %v182_v12, 0.0 }
 0x10c   :  { %v185_v15 = vpop.f32.mrf.mxu0 }
 0x10d   :  { %v186_v16 = vadd.f32 %v185_v15, %v118_v8  ;;  %v190_v17 = vmax.f32 %v184_v13, 0.0 }
 0x10f   :  { %v191_v19 = vmax.f32 %v186_v16, 0.0  ;;  %v192_v22 = vpack.c.bf16 %v190_v17, %v188_v20 }
 0x111   :  { %v193_v21 = vpack.c.bf16 %v191_v19, %v189_v18 }
 0x113   :  { %430 = vmatprep.mubr.bf16.mxu1 %v193_v21 }
 0x114   :  { %431 = vmatmul.mubr.bf16.vlgmr.msra.gmra.mxu1 %v192_v22 }
 0x115   :  { %1001 = vmatpush3.bf16.msra.mxu1 %v1136_v30 }
 0x116   :  { %1002 = vmatprep.subr.bf16.mxu1 %v1137_v31 }
 0x119   :  { %1003 = vmatpush3.bf16.msra.mxu1 %v1138_v32 }
 0x11a   :  { %1004 = vmatprep.subr.bf16.mxu1 %v1139_v33 }
 0x11d   :  { %1005 = vmatpush3.bf16.msra.mxu1 %v1140_v34 }
 0x11e   :  { %1006 = vmatprep.subr.bf16.mxu1 %v1141_v35 }
 0x121   :  { %1007 = vmatpush3.bf16.msra.mxu1 %v1142_v36 }
 0x122   :  { %1008 = vmatprep.subr.bf16.mxu1 %v1143_v37 }
 0x125   :  { %1009 = vmatpush3.bf16.msra.mxu1 %v1144_v38 }
 0x126   :  { %1010 = vmatprep.subr.bf16.mxu1 %v1145_v56 }
 0x129   :  { %1011 = vmatpush3.bf16.msra.mxu1 %v1146_v57 }
 0x12a   :  { %1012 = vmatprep.subr.bf16.mxu1 %v1147_v58 }
 0x12d   :  { %1013 = vmatpush3.bf16.msra.mxu1 %v1148_v59 }
 0x12e   :  { %1014 = vmatprep.subr.bf16.mxu1 %v1149_v60 }
 0x131   :  { %1015 = vmatpush3.bf16.msra.mxu1 %v1150_v61 }
 0x1d4   :  { %v432_v40 = vpop.f32.mrf.mxu1 }
 0x1d5   :  { %v433_v47 = vadd.f32 %v432_v40, %v231_v42 }
 0x1d6   :  { %v434_v43 = vpop.f32.mrf.mxu1 }
 0x1d7   :  { %v435_v45 = vadd.f32 %v434_v43, %v235_v41  ;;  %v441_v53 = vmax.f32 %v433_v47, 0.0 }
 0x1d8   :  { %v436_v44 = vpop.f32.mrf.mxu1 }
 0x1d9   :  { %v437_v46 = vadd.f32 %v436_v44, %v231_v42  ;;  %v442_v51 = vmax.f32 %v435_v45, 0.0 }
 0x1da   :  { %v438_v48 = vpop.f32.mrf.mxu1 }
 0x1db   :  { %v439_v49 = vadd.f32 %v438_v48, %v235_v41  ;;  %v443_v50 = vmax.f32 %v437_v46, 0.0 }
 0x1dd   :  { %v444_v52 = vmax.f32 %v439_v49, 0.0  ;;  %v445_v55 = vpack.c.bf16 %v443_v50, %v441_v53 }
 0x1df   :  { %v446_v54 = vpack.c.bf16 %v444_v52, %v442_v51 }
 0x1e1   :  { %683 = vmatprep.mubr.bf16.mxu0 %v446_v54 }
 0x1e2   :  { %684 = vmatmul.mubr.bf16.vlgmr.msra.gmra.mxu0 %v445_v55 }
 0x2a2   :  { %v685_v63 = vpop.f32.mrf.mxu0 }
 0x2a3   :  { %v686_v8 = vadd.f32 %v685_v63, %v484_v1 }
 0x2a4   :  { %v687_v2 = vpop.f32.mrf.mxu0 }
 0x2a5   :  { %v688_v6 = vadd.f32 %v687_v2, %v488_v0  ;;  %v694_v14 = vmax.f32 %v686_v8, 0.0 }
 0x2a6   :  { %v689_v3 = vpop.f32.mrf.mxu0 }
 0x2a7   :  { %v690_v7 = vadd.f32 %v689_v3, %v484_v1  ;;  %v695_v12 = vmax.f32 %v688_v6, 0.0 }
 0x2a8   :  { %v691_v9 = vpop.f32.mrf.mxu0 }
 0x2a9   :  { %v692_v10 = vadd.f32 %v691_v9, %v488_v0  ;;  %v696_v11 = vmax.f32 %v690_v7, 0.0 }
 0x2ab   :  { %v697_v13 = vmax.f32 %v692_v10, 0.0  ;;  %v698_v16 = vpack.c.bf16 %v696_v11, %v694_v14 }
 0x2ad   :  { %v699_v15 = vpack.c.bf16 %v697_v13, %v695_v12 }
 0x2af   :  { %867 = vmatprep.mubr.bf16.mxu1 %v699_v15 }
 0x2b0   :  { %868 = vmatmul.mubr.bf16.vlgmr.msra.gmra.mxu1 %v698_v16 }
 0x370   :  { %v1016_v17 = vpop.f32.mrf.mxu1 }
 0x372   :  { %v1017_v18 = vpop.f32.mrf.mxu1 }
 0x373   :  { %v1018_v19 = vadd.f32 %v1017_v18, %v1016_v17 }
 0x374   :  { %v1019_v4 = vpop.f32.mrf.mxu1 }
 0x375   :  { %v870_v22 = vadd.f32 %v1018_v19, %v974_v5 }
 0x376   :  { %v1020_v20 = vpop.f32.mrf.mxu1 }
 0x377   :  { %v1021_v21 = vadd.f32 %v1020_v20, %v1019_v4 }
 0x379   :  { %v873_v23 = vadd.f32 %v1021_v21, %v974_v5 }
 0x37b   :  { %v998_v24 = vpack.c.bf16 %v873_v23, %v870_v22 }
 0x37d   :  { %999 = vst [vmem:[#allocation11] sm:$0xff] %v998_v24  }
 0x37e   :  { %1262 = shalt.err (!%p1259_p1)
}
 0x37f   :  { %897 = dma.vmem_to_hbm [thread:$0]  %s892_s18, 128, %s1407_s9, [#allocation4], %s1286_s0, %s1286_s0, %s1287_s11  }
 0x380   :  { %1277 = dma.done.wait [#allocation4], 128  }
 0x381   :  { %1278 = vsyncadd [#allocation4], 4294967168 }
 0x382   :  { %901 = vsyncpa [#allocation3], 1 }
 0x383   :  { %902 = vsyncpa [#allocation6], 1 }
 0x384   :  { %903 = vsyncpa [#allocation9], 1 }
 0x385   :  { %904 = vsyncpa [#allocation4], 1 }

// kernel: tpu_custom_call.1
= control target key start
LH: loop header
LB: loop body
LE: loop exit
PB: predicated region body
PF: predicated region fallthrough
CT: control target
= control target key end

     0   :  { %14 = vsyncpa [#allocation3], 0  ;;  %s1398_s0 = inlined_call_operand.hbm [shape: f32[16,32], index: 0, kind: input, shape index: {}]   ;;  %s1399_s1 = inlined_call_operand.hbm [shape: bf16[32,256], index: 1, kind: input, shape index: {}]   ;;  %s1400_s2 = inlined_call_operand.vmem [shape: f32[1,256], index: 2, kind: input, shape index: {}]   ;;  %s1401_s3 = inlined_call_operand.hbm [shape: bf16[256,256], index: 3, kind: input, shape index: {}]   ;;  %s1402_s4 = inlined_call_operand.vmem [shape: f32[1,256], index: 4, kind: input, shape index: {}]   ;;  %s1403_s5 = inlined_call_operand.hbm [shape: bf16[256,256], index: 5, kind: input, shape index: {}]   ;;  %s1404_s6 = inlined_call_operand.vmem [shape: f32[1,256], index: 6, kind: input, shape index: {}]   ;;  %s1405_s7 = inlined_call_operand.hbm [shape: bf16[256,128], index: 7, kind: input, shape index: {}]   ;;  %s1406_s8 = inlined_call_operand.vmem [shape: f32[1,128], index: 8, kind: input, shape index: {}]   ;;  %s1407_s9 = inlined_call_operand.hbm [shape: bf16[16,128], index: 9, kind: output, shape index: {}]  }
   0x1   :  { %15 = vsyncpa [#allocation6], 0 }
   0x2   :  { %16 = vsyncpa [#allocation9], 0 }
   0x3   :  { %17 = vsyncpa [#allocation4], 0  ;;  %s1279_s30 = smov [#allocation5]   ;;  %s1280_s11 = smov [#allocation8]  }
   0x4   :  { %s35_s10 = sshll.u32 %s1279_s30, 4  ;;  %s63_s12 = sshll.u32 %s1280_s11, 4  ;;  %s36_s10 = int_to_ptr.vmem [resolvable:$true] %s35_s10  ;;  %s64_s12 = int_to_ptr.vmem [resolvable:$true] %s63_s12 }
   0x5   :  { %s1159_s13 = scalar_lea.vmem %s36_s10, 512  ;;  %p1164_p1 = scmp.lt.s32.totalorder %s36_s10, %s36_s10 }
   0x6   :  { %p1160_p0 = scmp.ne.s32.totalorder %s36_s10, %s1159_s13  ;;  %p1165_p2 = scmp.lt.s32.totalorder %s1159_s13, %s1159_s13 }
   0x8   :  { %p1166_p3 = por %p1165_p2, %p1164_p1 }
   0xa   :  { %p1167_p4 = pnand %p1166_p3, %p1160_p0 }
   0xc   :  { %1170 = shalt.err (!%p1167_p4)
}
   0xd   :  { %s1281_s14 = smov 128   ;;  %s1282_s15 = smov 8  }
   0xe   :  { %41 = dma.hbm_to_vmem [thread:$0]  %s1399_s1, 512, %s36_s10, [#allocation6], %s1281_s14, %s1281_s14, %s1282_s15  }
   0xf   :  { %s1179_s18 = scalar_lea.vmem %s64_s12, 4096  ;;  %p1184_p6 = scmp.lt.s32.totalorder %s64_s12, %s64_s12 }
  0x10   :  { %p1180_p5 = scmp.ne.s32.totalorder %s64_s12, %s1179_s18  ;;  %p1185_p7 = scmp.lt.s32.totalorder %s1179_s18, %s1179_s18 }
  0x12   :  { %p1186_p8 = por %p1185_p7, %p1184_p6 }
  0x14   :  { %p1187_p9 = pnand %p1186_p8, %p1180_p5 }
  0x16   :  { %1190 = shalt.err (!%p1187_p9)
}
  0x17   :  { %69 = dma.hbm_to_vmem [thread:$0]  %s1403_s5, 4096, %s64_s12, [#allocation9], %s1281_s14, %s1281_s14, %s1282_s15  }
  0x18   :  { %s1283_s21 = smov [#allocation2]   ;;  %s1284_s23 = smov [#allocation7]  }
  0x19   :  { %s23_s22 = sshll.u32 %s1283_s21, 4  ;;  %s49_s24 = sshll.u32 %s1284_s23, 4  ;;  %s24_s22 = int_to_ptr.vmem [resolvable:$true] %s23_s22  ;;  %s50_s24 = int_to_ptr.vmem [resolvable:$true] %s49_s24 }
  0x1a   :  { %s1199_s1 = scalar_lea.vmem %s24_s22, 256  ;;  %p1204_p11 = scmp.lt.s32.totalorder %s24_s22, %s24_s22 }
  0x1b   :  { %p1200_p10 = scmp.ne.s32.totalorder %s24_s22, %s1199_s1  ;;  %p1205_p12 = scmp.lt.s32.totalorder %s1199_s1, %s1199_s1 }
  0x1d   :  { %p1206_p13 = por %p1205_p12, %p1204_p11 }
  0x1f   :  { %p1207_p0 = pnand %p1206_p13, %p1200_p10 }
  0x21   :  { %1210 = shalt.err (!%p1207_p0)
}
  0x22   :  { %29 = dma.hbm_to_vmem [thread:$0]  %s1398_s0, 256, %s24_s22, [#allocation3], %s1281_s14, %s1281_s14, %s1282_s15  }
  0x23   :  { %s1219_s5 = scalar_lea.vmem %s50_s24, 4096  ;;  %p1224_p2 = scmp.lt.s32.totalorder %s50_s24, %s50_s24 }
  0x24   :  { %p1220_p1 = scmp.ne.s32.totalorder %s50_s24, %s1219_s5  ;;  %p1225_p3 = scmp.lt.s32.totalorder %s1219_s5, %s1219_s5 }
  0x26   :  { %p1226_p4 = por %p1225_p3, %p1224_p2 }
  0x28   :  { %p1227_p5 = pnand %p1226_p4, %p1220_p1 }
  0x2a   :  { %1230 = shalt.err (!%p1227_p5)
}
  0x2b   :  { %55 = dma.hbm_to_vmem [thread:$0]  %s1401_s3, 4096, %s50_s24, [#allocation6], %s1281_s14, %s1281_s14, %s1282_s15  }
  0x2c   :  { %s1285_s29 = smov [#allocation10]  }
  0x2d   :  { %s77_s30 = sshll.u32 %s1285_s29, 4  ;;  %s78_s30 = int_to_ptr.vmem [resolvable:$true] %s77_s30 }
  0x2e   :  { %s1239_s10 = scalar_lea.vmem %s78_s30, 2048  ;;  %p1244_p7 = scmp.lt.s32.totalorder %s78_s30, %s78_s30 }
  0x2f   :  { %p1240_p6 = scmp.ne.s32.totalorder %s78_s30, %s1239_s10  ;;  %p1245_p8 = scmp.lt.s32.totalorder %s1239_s10, %s1239_s10 }
  0x31   :  { %p1246_p9 = por %p1245_p8, %p1244_p7 }
  0x33   :  { %p1247_p10 = pnand %p1246_p9, %p1240_p6 }
  0x35   :  { %1250 = shalt.err (!%p1247_p10)
}
  0x36   :  { %s1286_s0 = smov 64   ;;  %s1287_s11 = smov 4  }
  0x37   :  { %83 = dma.hbm_to_vmem [thread:$0]  %s1405_s7, 2048, %s78_s30, [#allocation9], %s1286_s0, %s1286_s0, %s1287_s11  }
  0x38   :  { %1271 = dma.done.wait [#allocation3], 256  }
  0x39   :  { %1272 = vsyncadd [#allocation3], 4294967040 }
  0x3a   :  { %1273 = dma.done.wait [#allocation6], 4608  }
  0x3b   :  { %1274 = vsyncadd [#allocation6], 4294962688 }
  0x3c   :  { %1275 = dma.done.wait [#allocation9], 6144  }
  0x3d   :  { %1276 = vsyncadd [#allocation9], 4294961152  ;;  %v1288_v0 = vmov 0   ;;  %v1033_v1 = vld [vmem:[#allocation5 + $0x14] ss:$8 sps:$4 sm:$0xff]   ;;  %vm141_vm0 = vcmask 261120  }
  0x3e   :  { %177 = vmatprep.mubr.bf16.mxu0 %v1288_v0  ;;  %v1035_v2 = vld [vmem:[#allocation5 + $0x10] ss:$8 sps:$4 sm:$0xff]   ;;  %157 = vmatprep.subr.bf16.mxu0 %v1033_v1  ;;  %v1036_v3 = vld [vmem:[#allocation5 + $0x4] ss:$8 sps:$4 sm:$0xff]   ;;  %v1038_v4 = vld [vmem:[#allocation5] ss:$8 sps:$4 sm:$0xff]  }
  0x3f   :  { %v102_v5 = vld [vmem:[#allocation2] sm:$0xff]  ;;  %158 = vmatpush1.bf16.msra.mxu0 %v1035_v2  ;;  %v103_v6 = vld [vmem:[#allocation2 + $0x8] sm:$0xff]  ;;  %v1042_v9 = vld [vmem:[#allocation7 + $0x64] ss:$8 sps:$4 sm:$0xff]   ;;  %v111_v2 = vlaneseq  ;;  %s1289_s17 = smov [#allocation11]  }
  0x40   :  { %159 = vmatprep.subr.bf16.mxu0 %v1036_v3  ;;  %v1039_v7 = vld [vmem:[#allocation7 + $0x74] ss:$8 sps:$4 sm:$0xff]   ;;  %v1041_v8 = vld [vmem:[#allocation7 + $0x70] ss:$8 sps:$4 sm:$0xff]   ;;  %v104_v10 = vpack.c.bf16 %v103_v6, %v102_v5  ;;  %v1044_v11 = vld [vmem:[#allocation7 + $0x60] ss:$8 sps:$4 sm:$0xff]  }
  0x41   :  { %398 = vmatprep.subr.bf16.mxu1 %v1039_v7  ;;  %v1045_v12 = vld [vmem:[#allocation7 + $0x54] ss:$8 sps:$4 sm:$0xff]   ;;  %v1047_v13 = vld [vmem:[#allocation7 + $0x50] ss:$8 sps:$4 sm:$0xff]   ;;  %v1048_v14 = vld [vmem:[#allocation7 + $0x44] ss:$8 sps:$4 sm:$0xff]  }
  0x42   :  { %399 = vmatpush1.bf16.msra.mxu1 %v1041_v8  ;;  %v1050_v15 = vld [vmem:[#allocation7 + $0x40] ss:$8 sps:$4 sm:$0xff]   ;;  %v1051_v16 = vld [vmem:[#allocation7 + $0x34] ss:$8 sps:$4 sm:$0xff]   ;;  %v1053_v17 = vld [vmem:[#allocation7 + $0x30] ss:$8 sps:$4 sm:$0xff]  }
  0x43   :  { %160 = vmatpush1.bf16.msra.mxu0 %v1038_v4  ;;  %400 = vmatprep.subr.bf16.mxu1 %v1042_v9  ;;  %v1054_v18 = vld [vmem:[#allocation7 + $0x24] ss:$8 sps:$4 sm:$0xff]   ;;  %v1056_v19 = vld [vmem:[#allocation7 + $0x20] ss:$8 sps:$4 sm:$0xff]   ;;  %v1057_v20 = vld [vmem:[#allocation7 + $0x14] ss:$8 sps:$4 sm:$0xff]  }
  0x44   :  { %v1059_v21 = vld [vmem:[#allocation7 + $0x10] ss:$8 sps:$4 sm:$0xff]   ;;  %v1060_v22 = vld [vmem:[#allocation7 + $0x4] ss:$8 sps:$4 sm:$0xff]   ;;  %v1062_v23 = vld [vmem:[#allocation7] ss:$8 sps:$4 sm:$0xff]  }
  0x45   :  { %v1063_v24 = vld [vmem:[#allocation7 + $0xf4] ss:$8 sps:$4 sm:$0xff]   ;;  %v1065_v25 = vld [vmem:[#allocation7 + $0xf0] ss:$8 sps:$4 sm:$0xff]   ;;  %v1066_v26 = vld [vmem:[#allocation7 + $0xe4] ss:$8 sps:$4 sm:$0xff]  }
  0x46   :  { %909 = vmatmul.mubr.msk.bf16.vlgmr.msra.gmra.mxu0 %vm141_vm0, %v104_v10  ;;  %401 = vmatpush1.bf16.msra.mxu1 %v1044_v11  ;;  %v1068_v27 = vld [vmem:[#allocation7 + $0xe0] ss:$8 sps:$4 sm:$0xff]   ;;  %v1069_v28 = vld [vmem:[#allocation7 + $0xd4] ss:$8 sps:$4 sm:$0xff]   ;;  %v1071_v29 = vld [vmem:[#allocation7 + $0xd0] ss:$8 sps:$4 sm:$0xff]  }
  0x47   :  { %402 = vmatprep.subr.bf16.mxu1 %v1045_v12  ;;  %v1072_v30 = vld [vmem:[#allocation7 + $0xc4] ss:$8 sps:$4 sm:$0xff]   ;;  %v1074_v31 = vld [vmem:[#allocation7 + $0xc0] ss:$8 sps:$4 sm:$0xff]   ;;  %v1075_v32 = vld [vmem:[#allocation7 + $0xb4] ss:$8 sps:$4 sm:$0xff]  }
  0x48   :  { %v1077_v33 = vld [vmem:[#allocation7 + $0xb0] ss:$8 sps:$4 sm:$0xff]   ;;  %v1078_v34 = vld [vmem:[#allocation7 + $0xa4] ss:$8 sps:$4 sm:$0xff]   ;;  %v1080_v35 = vld [vmem:[#allocation7 + $0xa0] ss:$8 sps:$4 sm:$0xff]  }
  0x49   :  { %v1081_v36 = vld [vmem:[#allocation7 + $0x94] ss:$8 sps:$4 sm:$0xff]   ;;  %v1083_v37 = vld [vmem:[#allocation7 + $0x90] ss:$8 sps:$4 sm:$0xff]   ;;  %v1084_v38 = vld [vmem:[#allocation7 + $0x84] ss:$8 sps:$4 sm:$0xff]  }
  0x4a   :  { %403 = vmatpush1.bf16.msra.mxu1 %v1047_v13  ;;  %v1086_v39 = vld [vmem:[#allocation7 + $0x80] ss:$8 sps:$4 sm:$0xff]   ;;  %v1087_v40 = vld [vmem:[#allocation8 + $0x70] ss:$8 sps:$4 sm:$0xff]   ;;  %v1089_v41 = vld [vmem:[#allocation8 + $0x74] ss:$8 sps:$4 sm:$0xff]  }
  0x4b   :  { %404 = vmatprep.subr.bf16.mxu1 %v1048_v14  ;;  %v1092_v42 = vld [vmem:[#allocation8 + $0x64] ss:$8 sps:$4 sm:$0xff]   ;;  %651 = vmatprep.subr.bf16.mxu0 %v1089_v41  ;;  %v1090_v43 = vld [vmem:[#allocation8 + $0x60] ss:$8 sps:$4 sm:$0xff]   ;;  %v1095_v44 = vld [vmem:[#allocation8 + $0x54] ss:$8 sps:$4 sm:$0xff]  }
  0x4c   :  { %652 = vmatpush1.bf16.msra.mxu0 %v1087_v40  ;;  %v1093_v45 = vld [vmem:[#allocation8 + $0x50] ss:$8 sps:$4 sm:$0xff]   ;;  %v1098_v46 = vld [vmem:[#allocation8 + $0x44] ss:$8 sps:$4 sm:$0xff]   ;;  %v1096_v47 = vld [vmem:[#allocation8 + $0x40] ss:$8 sps:$4 sm:$0xff]  }
  0x4d   :  { %653 = vmatprep.subr.bf16.mxu0 %v1092_v42  ;;  %v1101_v48 = vld [vmem:[#allocation8 + $0x34] ss:$8 sps:$4 sm:$0xff]   ;;  %v1099_v49 = vld [vmem:[#allocation8 + $0x30] ss:$8 sps:$4 sm:$0xff]   ;;  %v1104_v50 = vld [vmem:[#allocation8 + $0x24] ss:$8 sps:$4 sm:$0xff]  }
  0x4e   :  { %405 = vmatpush1.bf16.msra.mxu1 %v1050_v15  ;;  %v1102_v51 = vld [vmem:[#allocation8 + $0x20] ss:$8 sps:$4 sm:$0xff]   ;;  %v1107_v52 = vld [vmem:[#allocation8 + $0x14] ss:$8 sps:$4 sm:$0xff]   ;;  %v1105_v53 = vld [vmem:[#allocation8 + $0x10] ss:$8 sps:$4 sm:$0xff]  }
  0x4f   :  { %406 = vmatprep.subr.bf16.mxu1 %v1051_v16  ;;  %v1110_v54 = vld [vmem:[#allocation8 + $0x4] ss:$8 sps:$4 sm:$0xff]   ;;  %v1108_v55 = vld [vmem:[#allocation8] ss:$8 sps:$4 sm:$0xff]   ;;  %v1113_v56 = vld [vmem:[#allocation8 + $0xf4] ss:$8 sps:$4 sm:$0xff]  }
  0x50   :  { %654 = vmatpush1.bf16.msra.mxu0 %v1090_v43  ;;  %v1111_v57 = vld [vmem:[#allocation8 + $0xf0] ss:$8 sps:$4 sm:$0xff]   ;;  %v1116_v58 = vld [vmem:[#allocation8 + $0xe4] ss:$8 sps:$4 sm:$0xff]   ;;  %v1114_v59 = vld [vmem:[#allocation8 + $0xe0] ss:$8 sps:$4 sm:$0xff]  }
  0x51   :  { %655 = vmatprep.subr.bf16.mxu0 %v1095_v44  ;;  %v1119_v60 = vld [vmem:[#allocation8 + $0xd4] ss:$8 sps:$4 sm:$0xff]   ;;  %v1117_v61 = vld [vmem:[#allocation8 + $0xd0] ss:$8 sps:$4 sm:$0xff]   ;;  %v1122_v62 = vld [vmem:[#allocation8 + $0xc4] ss:$8 sps:$4 sm:$0xff]  }
  0x52   :  { %407 = vmatpush1.bf16.msra.mxu1 %v1053_v17  ;;  %v1120_v63 = vld [vmem:[#allocation8 + $0xc0] ss:$8 sps:$4 sm:$0xff]   ;;  %v1125_v0 = vld [vmem:[#allocation8 + $0xb4] ss:$8 sps:$4 sm:$0xff]   ;;  %v1123_v1 = vld [vmem:[#allocation8 + $0xb0] ss:$8 sps:$4 sm:$0xff]  }
  0x53   :  { %408 = vmatprep.subr.bf16.mxu1 %v1054_v18  ;;  %v112_v3 = vshrl.u32 %v111_v2, 7  ;;  %v109_v6 = vld [vmem:[%s1400_s2] sm:$0x3]  ;;  %s891_s18 = sshll.u32 %s1289_s17, 4  ;;  %s892_s18 = int_to_ptr.vmem [resolvable:$true] %s891_s18 }
  0x54   :  { %656 = vmatpush1.bf16.msra.mxu0 %v1093_v45  ;;  %s1251_s19 = scalar_lea.vmem %s892_s18, 128  ;;  %p1256_p12 = scmp.lt.s32.totalorder %s892_s18, %s892_s18 }
  0x55   :  { %657 = vmatprep.subr.bf16.mxu0 %v1098_v46  ;;  %v1370_v4 = vsub.s32 1, %v112_v3  ;;  %v1372_v5 = vsub.s32 0, %v112_v3  ;;  %p1252_p11 = scmp.ne.s32.totalorder %s892_s18, %s1251_s19  ;;  %p1257_p13 = scmp.lt.s32.totalorder %s1251_s19, %s1251_s19 }
  0x56   :  { %409 = vmatpush1.bf16.msra.mxu1 %v1056_v19 }
  0x57   :  { %410 = vmatprep.subr.bf16.mxu1 %v1057_v20  ;;  %v118_v8 = vrot.slane %v109_v6, %v1370_v4  ;;  %v114_v9 = vrot.slane %v109_v6, %v1372_v5  ;;  %p1258_p0 = por %p1257_p13, %p1256_p12 }
  0x58   :  { %658 = vmatpush1.bf16.msra.mxu0 %v1096_v47 }
  0x59   :  { %659 = vmatprep.subr.bf16.mxu0 %v1101_v48  ;;  %p1259_p1 = pnand %p1258_p0, %p1252_p11 }
  0x5a   :  { %411 = vmatpush1.bf16.msra.mxu1 %v1059_v21 }
  0x5b   :  { %412 = vmatprep.subr.bf16.mxu1 %v1060_v22 }
  0x5c   :  { %660 = vmatpush1.bf16.msra.mxu0 %v1099_v49 }
  0x5d   :  { %661 = vmatprep.subr.bf16.mxu0 %v1104_v50 }
  0x5e   :  { %413 = vmatpush1.bf16.msra.mxu1 %v1062_v23  ;;  %v1128_v23 = vld [vmem:[#allocation8 + $0xa4] ss:$8 sps:$4 sm:$0xff]  }
  0x5f   :  { %414 = vmatprep.subr.bf16.mxu1 %v1063_v24  ;;  %v1126_v24 = vld [vmem:[#allocation8 + $0xa0] ss:$8 sps:$4 sm:$0xff]  }
  0x60   :  { %662 = vmatpush1.bf16.msra.mxu0 %v1102_v51 }
  0x61   :  { %663 = vmatprep.subr.bf16.mxu0 %v1107_v52 }
  0x62   :  { %415 = vmatpush2.bf16.msra.mxu1 %v1065_v25  ;;  %v1131_v25 = vld [vmem:[#allocation8 + $0x94] ss:$8 sps:$4 sm:$0xff]  }
  0x63   :  { %416 = vmatprep.subr.bf16.mxu1 %v1066_v26  ;;  %v1129_v26 = vld [vmem:[#allocation8 + $0x90] ss:$8 sps:$4 sm:$0xff]  }
  0x64   :  { %664 = vmatpush1.bf16.msra.mxu0 %v1105_v53 }
  0x65   :  { %665 = vmatprep.subr.bf16.mxu0 %v1110_v54 }
  0x66   :  { %417 = vmatpush2.bf16.msra.mxu1 %v1068_v27  ;;  %v1134_v27 = vld [vmem:[#allocation8 + $0x84] ss:$8 sps:$4 sm:$0xff]  }
  0x67   :  { %418 = vmatprep.subr.bf16.mxu1 %v1069_v28  ;;  %v1132_v28 = vld [vmem:[#allocation8 + $0x80] ss:$8 sps:$4 sm:$0xff]  }
  0x68   :  { %666 = vmatpush1.bf16.msra.mxu0 %v1108_v55 }
  0x69   :  { %667 = vmatprep.subr.bf16.mxu0 %v1113_v56  ;;  %v1145_v56 = vld [vmem:[#allocation10 + $0x50] sm:$0xff]  }
  0x6a   :  { %419 = vmatpush2.bf16.msra.mxu1 %v1071_v29  ;;  %v1135_v29 = vld [vmem:[#allocation10 + $0x78] sm:$0xff]  }
  0x6b   :  { %420 = vmatprep.subr.bf16.mxu1 %v1072_v30  ;;  %v1136_v30 = vld [vmem:[#allocation10 + $0x38] sm:$0xff]  }
  0x6c   :  { %668 = vmatpush2.bf16.msra.mxu0 %v1111_v57  ;;  %v1146_v57 = vld [vmem:[#allocation10 + $0x10] sm:$0xff]  }
  0x6d   :  { %669 = vmatprep.subr.bf16.mxu0 %v1116_v58  ;;  %v1147_v58 = vld [vmem:[#allocation10 + $0x48] sm:$0xff]  }
  0x6e   :  { %421 = vmatpush2.bf16.msra.mxu1 %v1074_v31  ;;  %v1137_v31 = vld [vmem:[#allocation10 + $0x70] sm:$0xff]  }
  0x6f   :  { %422 = vmatprep.subr.bf16.mxu1 %v1075_v32  ;;  %v1138_v32 = vld [vmem:[#allocation10 + $0x30] sm:$0xff]  }
  0x70   :  { %670 = vmatpush2.bf16.msra.mxu0 %v1114_v59  ;;  %v1148_v59 = vld [vmem:[#allocation10 + $0x8] sm:$0xff]  }
  0x71   :  { %671 = vmatprep.subr.bf16.mxu0 %v1119_v60  ;;  %v1149_v60 = vld [vmem:[#allocation10 + $0x40] sm:$0xff]  }
  0x72   :  { %423 = vmatpush2.bf16.msra.mxu1 %v1077_v33  ;;  %v1139_v33 = vld [vmem:[#allocation10 + $0x68] sm:$0xff]  }
  0x73   :  { %424 = vmatprep.subr.bf16.mxu1 %v1078_v34  ;;  %v1140_v34 = vld [vmem:[#allocation10 + $0x28] sm:$0xff]  }
  0x74   :  { %672 = vmatpush2.bf16.msra.mxu0 %v1117_v61  ;;  %v1150_v61 = vld [vmem:[#allocation10] sm:$0xff]  }
  0x75   :  { %673 = vmatprep.subr.bf16.mxu0 %v1122_v62  ;;  %v479_v62 = vld [vmem:[%s1404_s6] sm:$0x3] }
  0x76   :  { %425 = vmatpush2.bf16.msra.mxu1 %v1080_v35  ;;  %v1141_v35 = vld [vmem:[#allocation10 + $0x60] sm:$0xff]  }
  0x77   :  { %426 = vmatprep.subr.bf16.mxu1 %v1081_v36  ;;  %v1142_v36 = vld [vmem:[#allocation10 + $0x20] sm:$0xff]  }
  0x78   :  { %674 = vmatpush2.bf16.msra.mxu0 %v1120_v63 }
  0x79   :  { %675 = vmatprep.subr.bf16.mxu0 %v1125_v0  ;;  %v488_v0 = vrot.slane %v479_v62, %v1370_v4 }
  0x7a   :  { %427 = vmatpush2.bf16.msra.mxu1 %v1083_v37  ;;  %v1143_v37 = vld [vmem:[#allocation10 + $0x58] sm:$0xff]  }
  0x7b   :  { %428 = vmatprep.subr.bf16.mxu1 %v1084_v38  ;;  %v1144_v38 = vld [vmem:[#allocation10 + $0x18] sm:$0xff]  }
  0x7c   :  { %676 = vmatpush2.bf16.msra.mxu0 %v1123_v1  ;;  %v484_v1 = vrot.slane %v479_v62, %v1372_v5 }
  0x7d   :  { %677 = vmatprep.subr.bf16.mxu0 %v1128_v23 }
  0x7e   :  { %429 = vmatpush2.bf16.msra.mxu1 %v1086_v39  ;;  %v226_v39 = vld [vmem:[%s1402_s4] sm:$0x3] }
  0x7f   :  { %1000 = vmatprep.subr.bf16.mxu1 %v1135_v29  ;;  %v235_v41 = vrot.slane %v226_v39, %v1370_v4  ;;  %v231_v42 = vrot.slane %v226_v39, %v1372_v5  ;;  %v974_v5 = vld [vmem:[%s1406_s8] ss:$0 sm:$0xff] }
  0x80   :  { %678 = vmatpush2.bf16.msra.mxu0 %v1126_v24 }
  0x81   :  { %679 = vmatprep.subr.bf16.mxu0 %v1131_v25 }
  0x84   :  { %680 = vmatpush2.bf16.msra.mxu0 %v1129_v26 }
  0x85   :  { %681 = vmatprep.subr.bf16.mxu0 %v1134_v27 }
  0x88   :  { %682 = vmatpush2.bf16.msra.mxu0 %v1132_v28 }
 0x106   :  { %v179_v7 = vpop.f32.mrf.mxu0 }
 0x107   :  { %v180_v14 = vadd.f32 %v179_v7, %v114_v9 }
 0x108   :  { %v181_v10 = vpop.f32.mrf.mxu0 }
 0x109   :  { %v182_v12 = vadd.f32 %v181_v10, %v118_v8  ;;  %v188_v20 = vmax.f32 %v180_v14, 0.0 }
 0x10a   :  { %v183_v11 = vpop.f32.mrf.mxu0 }
 0x10b   :  { %v184_v13 = vadd.f32 %v183_v11, %v114_v9  ;;  %v189_v18 = vmax.f32 %v182_v12, 0.0 }
 0x10c   :  { %v185_v15 = vpop.f32.mrf.mxu0 }
 0x10d   :  { %v186_v16 = vadd.f32 %v185_v15, %v118_v8  ;;  %v190_v17 = vmax.f32 %v184_v13, 0.0 }
 0x10f   :  { %v191_v19 = vmax.f32 %v186_v16, 0.0  ;;  %v192_v22 = vpack.c.bf16 %v190_v17, %v188_v20 }
 0x111   :  { %v193_v21 = vpack.c.bf16 %v191_v19, %v189_v18 }
 0x113   :  { %430 = vmatprep.mubr.bf16.mxu1 %v193_v21 }
 0x114   :  { %431 = vmatmul.mubr.bf16.vlgmr.msra.gmra.mxu1 %v192_v22 }
 0x115   :  { %1001 = vmatpush3.bf16.msra.mxu1 %v1136_v30 }
 0x116   :  { %1002 = vmatprep.subr.bf16.mxu1 %v1137_v31 }
 0x119   :  { %1003 = vmatpush3.bf16.msra.mxu1 %v1138_v32 }
 0x11a   :  { %1004 = vmatprep.subr.bf16.mxu1 %v1139_v33 }
 0x11d   :  { %1005 = vmatpush3.bf16.msra.mxu1 %v1140_v34 }
 0x11e   :  { %1006 = vmatprep.subr.bf16.mxu1 %v1141_v35 }
 0x121   :  { %1007 = vmatpush3.bf16.msra.mxu1 %v1142_v36 }
 0x122   :  { %1008 = vmatprep.subr.bf16.mxu1 %v1143_v37 }
 0x125   :  { %1009 = vmatpush3.bf16.msra.mxu1 %v1144_v38 }
 0x126   :  { %1010 = vmatprep.subr.bf16.mxu1 %v1145_v56 }
 0x129   :  { %1011 = vmatpush3.bf16.msra.mxu1 %v1146_v57 }
 0x12a   :  { %1012 = vmatprep.subr.bf16.mxu1 %v1147_v58 }
 0x12d   :  { %1013 = vmatpush3.bf16.msra.mxu1 %v1148_v59 }
 0x12e   :  { %1014 = vmatprep.subr.bf16.mxu1 %v1149_v60 }
 0x131   :  { %1015 = vmatpush3.bf16.msra.mxu1 %v1150_v61 }
 0x1d4   :  { %v432_v40 = vpop.f32.mrf.mxu1 }
 0x1d5   :  { %v433_v47 = vadd.f32 %v432_v40, %v231_v42 }
 0x1d6   :  { %v434_v43 = vpop.f32.mrf.mxu1 }
 0x1d7   :  { %v435_v45 = vadd.f32 %v434_v43, %v235_v41  ;;  %v441_v53 = vmax.f32 %v433_v47, 0.0 }
 0x1d8   :  { %v436_v44 = vpop.f32.mrf.mxu1 }
 0x1d9   :  { %v437_v46 = vadd.f32 %v436_v44, %v231_v42  ;;  %v442_v51 = vmax.f32 %v435_v45, 0.0 }
 0x1da   :  { %v438_v48 = vpop.f32.mrf.mxu1 }
 0x1db   :  { %v439_v49 = vadd.f32 %v438_v48, %v235_v41  ;;  %v443_v50 = vmax.f32 %v437_v46, 0.0 }
 0x1dd   :  { %v444_v52 = vmax.f32 %v439_v49, 0.0  ;;  %v445_v55 = vpack.c.bf16 %v443_v50, %v441_v53 }
 0x1df   :  { %v446_v54 = vpack.c.bf16 %v444_v52, %v442_v51 }
 0x1e1   :  { %683 = vmatprep.mubr.bf16.mxu0 %v446_v54 }
 0x1e2   :  { %684 = vmatmul.mubr.bf16.vlgmr.msra.gmra.mxu0 %v445_v55 }
 0x2a2   :  { %v685_v63 = vpop.f32.mrf.mxu0 }
 0x2a3   :  { %v686_v8 = vadd.f32 %v685_v63, %v484_v1 }
 0x2a4   :  { %v687_v2 = vpop.f32.mrf.mxu0 }
 0x2a5   :  { %v688_v6 = vadd.f32 %v687_v2, %v488_v0  ;;  %v694_v14 = vmax.f32 %v686_v8, 0.0 }
 0x2a6   :  { %v689_v3 = vpop.f32.mrf.mxu0 }
 0x2a7   :  { %v690_v7 = vadd.f32 %v689_v3, %v484_v1  ;;  %v695_v12 = vmax.f32 %v688_v6, 0.0 }
 0x2a8   :  { %v691_v9 = vpop.f32.mrf.mxu0 }
 0x2a9   :  { %v692_v10 = vadd.f32 %v691_v9, %v488_v0  ;;  %v696_v11 = vmax.f32 %v690_v7, 0.0 }
 0x2ab   :  { %v697_v13 = vmax.f32 %v692_v10, 0.0  ;;  %v698_v16 = vpack.c.bf16 %v696_v11, %v694_v14 }
 0x2ad   :  { %v699_v15 = vpack.c.bf16 %v697_v13, %v695_v12 }
 0x2af   :  { %867 = vmatprep.mubr.bf16.mxu1 %v699_v15 }
 0x2b0   :  { %868 = vmatmul.mubr.bf16.vlgmr.msra.gmra.mxu1 %v698_v16 }
 0x370   :  { %v1016_v17 = vpop.f32.mrf.mxu1 }
 0x372   :  { %v1017_v18 = vpop.f32.mrf.mxu1 }
 0x373   :  { %v1018_v19 = vadd.f32 %v1017_v18, %v1016_v17 }
 0x374   :  { %v1019_v4 = vpop.f32.mrf.mxu1 }
 0x375   :  { %v870_v22 = vadd.f32 %v1018_v19, %v974_v5 }
 0x376   :  { %v1020_v20 = vpop.f32.mrf.mxu1 }
 0x377   :  { %v1021_v21 = vadd.f32 %v1020_v20, %v1019_v4 }
 0x379   :  { %v873_v23 = vadd.f32 %v1021_v21, %v974_v5 }
 0x37b   :  { %v998_v24 = vpack.c.bf16 %v873_v23, %v870_v22 }
 0x37d   :  { %999 = vst [vmem:[#allocation11] sm:$0xff] %v998_v24  }
 0x37e   :  { %1262 = shalt.err (!%p1259_p1)
}
 0x37f   :  { %897 = dma.vmem_to_hbm [thread:$0]  %s892_s18, 128, %s1407_s9, [#allocation4], %s1286_s0, %s1286_s0, %s1287_s11  }
 0x380   :  { %1277 = dma.done.wait [#allocation4], 128  }
 0x381   :  { %1278 = vsyncadd [#allocation4], 4294967168 }
 0x382   :  { %901 = vsyncpa [#allocation3], 1 }
 0x383   :  { %902 = vsyncpa [#allocation6], 1 }
 0x384   :  { %903 = vsyncpa [#allocation9], 1 }
 0x385   :  { %904 = vsyncpa [#allocation4], 1 }

</bundles_post_ra>
